<compile_context>
chip_gen: v5e
topology: v5e:2x2
jax: 0.10.0
libtpu: 0.0.40
codegen_flags: <defaults>
</compile_context>

<pallas_src>
import functools

import jax
import jax.numpy as jnp
from jax.experimental import pallas as pl
from jax.experimental.pallas import tpu as pltpu

# ---- module configuration (mirrors qlc/train_lstm.py) ----
idx_output_size_class = {1: 'sum', 2: 'median', 3: 'consecutive', 4: 'odd',
                         5: 'ac', 6: 'wuxing_ke', 7: 'prime', 8: 'partition', 9: 'luckman'}
INPUT_SIZE = 19
HIDDEN_SIZE = 64
NUM_LAYERS = 1  # single layer (kernel implements exactly one LSTM layer)
NUM_CLASSES = {'sum': 5, 'median': 3, 'consecutive': 2, 'odd': 4,
               'ac': 6, 'wuxing_ke': 5, 'prime': 2, 'partition': 7, 'luckman': 3}

_SUBLANE = 8
_LANE = 128


def _round_up(x, m):
    return ((x + m - 1) // m) * m


def _lstm_heads_kernel(x_ref, wih_ref, whh_ref, b_ref, wfc_ref, bfc_ref, out_ref,
                       *, seq_len, batch_pad, hidden_pad):
    """Whole LSTM + fused heads in one kernel invocation.

    x_ref   : (S*Bp, I)      time-major, batch padded to Bp (multiple of 8)
    wih_ref : (I, 4*Hp)      gate-padded W_ih^T (each gate in its own 128-lane slot)
    whh_ref : (Hp, 4*Hp)     gate-padded W_hh^T (rows H:Hp are zero)
    b_ref   : (1, 4*Hp)      gate-padded b_ih + b_hh
    wfc_ref : (Hp, Tp)       fused, zero-padded FC head weights
    bfc_ref : (1, Tp)        fused, zero-padded FC head biases
    out_ref : (Bp, Tp)       lane-dense logits tile
    """
    S, BP, HP = seq_len, batch_pad, hidden_pad

    # Hoisted input projection for ALL timesteps: one big MXU matmul instead of S tiny ones.
    xw = (jnp.dot(x_ref[...], wih_ref[...], preferred_element_type=jnp.float32)
          + b_ref[...])                                           # (S*Bp, 4*Hp)

    # Loop-invariant weight load, hoisted out of the recurrence.
    whh = whh_ref[...]                                            # (Hp, 4*Hp)

    h = jnp.zeros((BP, HP), jnp.float32)
    c = jnp.zeros((BP, HP), jnp.float32)

    # Fully unrolled static recurrence (S is small & static) — the LLO scheduler sees the
    # whole dependence chain; each step's xw rows are one aligned sublane tile.
    for t in range(S):
        gates = xw[t * BP:(t + 1) * BP, :] + jnp.dot(
            h, whh, preferred_element_type=jnp.float32)           # (Bp, 4*Hp)
        # 128-lane-aligned gate slices (PyTorch order i, f, g, o).
        i_g = jax.nn.sigmoid(gates[:, 0 * HP:1 * HP])
        f_g = jax.nn.sigmoid(gates[:, 1 * HP:2 * HP])
        g_g = jnp.tanh(gates[:, 2 * HP:3 * HP])
        o_g = jax.nn.sigmoid(gates[:, 3 * HP:4 * HP])
        c = f_g * c + i_g * g_g
        h = o_g * jnp.tanh(c)

    # Fused classification heads on the last hidden state; lane-dense store.
    logits = (jnp.dot(h, wfc_ref[...], preferred_element_type=jnp.float32)
              + bfc_ref[...])
    out_ref[...] = logits.astype(out_ref.dtype)


def prepare_params(w_ih, w_hh, b_ih, b_hh, fc_weights, fc_biases):
    """One-time weight preprocessing (kept OUT of the jitted forward).

    Returns gate-padded, lane-aligned weights plus the true total number of logits.
      w_ih : (4H, I), w_hh : (4H, H), b_ih/b_hh : (4H,)  -- PyTorch layouts.
    """
    H = w_hh.shape[1]
    I = w_ih.shape[1]
    HP = _round_up(H, _LANE)                                       # 128

    wih_t = jnp.transpose(w_ih).astype(jnp.float32)                # (I, 4H)
    whh_t = jnp.transpose(w_hh).astype(jnp.float32)                # (H, 4H)
    b = (b_ih + b_hh).astype(jnp.float32)                          # (4H,)

    # Scatter each gate into its own 128-lane slot (zeros elsewhere).
    wih_p = jnp.zeros((I, 4 * HP), jnp.float32)
    whh_p = jnp.zeros((HP, 4 * HP), jnp.float32)
    b_p = jnp.zeros((1, 4 * HP), jnp.float32)
    for g in range(4):
        wih_p = wih_p.at[:, g * HP:g * HP + H].set(wih_t[:, g * H:(g + 1) * H])
        whh_p = whh_p.at[:H, g * HP:g * HP + H].set(whh_t[:, g * H:(g + 1) * H])
        b_p = b_p.at[0, g * HP:g * HP + H].set(b[g * H:(g + 1) * H])

    # Fuse all classification heads into one matmul, zero-padded to a lane-dense width.
    w_fc = jnp.concatenate([jnp.transpose(w).astype(jnp.float32) for w in fc_weights],
                           axis=1)                                 # (H, T)
    b_fc = jnp.concatenate(fc_biases, axis=0).astype(jnp.float32)  # (T,)
    T = w_fc.shape[1]
    TP = _round_up(T, _LANE)                                       # 128
    wfc_p = jnp.zeros((HP, TP), jnp.float32).at[:H, :T].set(w_fc)
    bfc_p = jnp.zeros((1, TP), jnp.float32).at[0, :T].set(b_fc)

    return (wih_p, whh_p, b_p, wfc_p, bfc_p), T


@functools.partial(jax.jit, static_argnames=("num_out",))
def lstm_classifier_forward(x, wih_p, whh_p, b_p, wfc_p, bfc_p, *, num_out):
    """x: (batch, seq, input_size) float32 — same as the PyTorch batch_first input."""
    B, S, I = x.shape
    HP = whh_p.shape[0]
    TP = wfc_p.shape[1]
    BP = _round_up(B, _SUBLANE)

    # Time-major, batch padded to a sublane multiple, flattened to (S*Bp, I) so the kernel's
    # per-step row slices are whole sublane tiles.
    x_tm = jnp.transpose(x, (1, 0, 2)).astype(jnp.float32)         # (S, B, I)
    if BP != B:
        x_tm = jnp.pad(x_tm, ((0, 0), (0, BP - B), (0, 0)))
    x2d = x_tm.reshape(S * BP, I)

    kernel = functools.partial(_lstm_heads_kernel,
                               seq_len=S, batch_pad=BP, hidden_pad=HP)

    logits_pad = pl.pallas_call(
        kernel,
        out_shape=jax.ShapeDtypeStruct((BP, TP), jnp.float32),
        in_specs=[pl.BlockSpec(memory_space=pltpu.MemorySpace.VMEM)] * 6,
        out_specs=pl.BlockSpec(memory_space=pltpu.MemorySpace.VMEM),
    )(x2d, wih_p, whh_p, b_p, wfc_p, bfc_p)

    return logits_pad[:B, :num_out]


def init_params(key, input_size, hidden_size, num_classes):
    """Deterministic parameter init (PyTorch-style uniform(-1/sqrt(H), 1/sqrt(H)))."""
    H = hidden_size
    bound = 1.0 / jnp.sqrt(jnp.float32(H))
    keys = jax.random.split(key, 4 + 2 * len(num_classes))
    w_ih = jax.random.uniform(keys[0], (4 * H, input_size), jnp.float32, -bound, bound)
    w_hh = jax.random.uniform(keys[1], (4 * H, H), jnp.float32, -bound, bound)
    b_ih = jax.random.uniform(keys[2], (4 * H,), jnp.float32, -bound, bound)
    b_hh = jax.random.uniform(keys[3], (4 * H,), jnp.float32, -bound, bound)
    fc_weights, fc_biases = [], []
    for i, (_, n_cls) in enumerate(num_classes.items()):
        fc_weights.append(jax.random.uniform(keys[4 + 2 * i], (n_cls, H),
                                             jnp.float32, -bound, bound))
        fc_biases.append(jax.random.uniform(keys[5 + 2 * i], (n_cls,),
                                            jnp.float32, -bound, bound))
    return w_ih, w_hh, b_ih, b_hh, fc_weights, fc_biases


def split_heads(logits_all, num_classes):
    """Split fused-head logits into the per-task dict keyed by idx_output_size_class."""
    out = {}
    off = 0
    for i, (_, n_cls) in enumerate(num_classes.items()):
        out[idx_output_size_class[i + 1]] = logits_all[:, off:off + n_cls]
        off += n_cls
    return out


def _reference_forward(x, w_ih, w_hh, b_ih, b_hh, fc_weights, fc_biases):
    """Pure-JAX reference with PyTorch LSTM semantics, for correctness checking."""
    B, S, _ = x.shape
    H = w_hh.shape[1]
    h = jnp.zeros((B, H), jnp.float32)
    c = jnp.zeros((B, H), jnp.float32)
    for t in range(S):
        gates = x[:, t, :] @ w_ih.T + b_ih + h @ w_hh.T + b_hh
        i_g = jax.nn.sigmoid(gates[:, 0 * H:1 * H])
        f_g = jax.nn.sigmoid(gates[:, 1 * H:2 * H])
        g_g = jnp.tanh(gates[:, 2 * H:3 * H])
        o_g = jax.nn.sigmoid(gates[:, 3 * H:4 * H])
        c = f_g * c + i_g * g_g
        h = o_g * jnp.tanh(c)
    return jnp.concatenate([h @ w.T + b for w, b in zip(fc_weights, fc_biases)], axis=1)


if __name__ == "__main__":
    key = jax.random.PRNGKey(0)
    k_param, k_x = jax.random.split(key)

    batch, seq = 2, 8
    raw_params = init_params(k_param, INPUT_SIZE, HIDDEN_SIZE, NUM_CLASSES)
    packed_params, total_classes = prepare_params(*raw_params)
    x = jax.random.normal(k_x, (batch, seq, INPUT_SIZE), jnp.float32)

    logits_all = lstm_classifier_forward(x, *packed_params, num_out=total_classes)
    jax.block_until_ready(logits_all)

    # correctness check against a pure-JAX PyTorch-semantics reference
    ref = _reference_forward(x, *raw_params)
    assert logits_all.shape == ref.shape == (batch, total_classes)
    assert jnp.allclose(logits_all, ref, atol=2e-4, rtol=2e-4), \
        float(jnp.max(jnp.abs(logits_all - ref)))

    class_output = split_heads(logits_all, NUM_CLASSES)
    assert set(class_output.keys()) == set(idx_output_size_class.values())
    for name, n_cls in NUM_CLASSES.items():
        assert class_output[name].shape == (batch, n_cls)

    print("KERNEL_OK")
</pallas_src>

<mosaic_0001>
module attributes {stable_mosaic.version = 11 : i64} {
  func.func @_lstm_heads_kernel(%arg0: memref<64x19xf32, #tpu.memory_space<vmem>>, %arg1: memref<19x512xf32, #tpu.memory_space<vmem>>, %arg2: memref<128x512xf32, #tpu.memory_space<vmem>>, %arg3: memref<1x512xf32, #tpu.memory_space<vmem>>, %arg4: memref<128x128xf32, #tpu.memory_space<vmem>>, %arg5: memref<1x128xf32, #tpu.memory_space<vmem>>, %arg6: memref<8x128xf32, #tpu.memory_space<vmem>>) attributes {dimension_semantics = [], scalar_prefetch = 0 : i64, scratch_operands = 0 : i64, tpu.core_type = #tpu.core_type<tc>} {
    %c0 = arith.constant 0 : index
    %c0_0 = arith.constant 0 : index
    %0 = vector.load %arg0[%c0, %c0_0] : memref<64x19xf32, #tpu.memory_space<vmem>>, vector<64x19xf32>
    %c0_1 = arith.constant 0 : index
    %c0_2 = arith.constant 0 : index
    %1 = vector.load %arg1[%c0_1, %c0_2] : memref<19x512xf32, #tpu.memory_space<vmem>>, vector<19x512xf32>
    %cst = arith.constant dense<0.000000e+00> : vector<64x512xf32>
    %2 = tpu.matmul %0, %1, %cst {dimension_numbers = #tpu.dot_dimension_numbers<[1], [0], [0], [1], [0, 0, 1, 1], [], []>} : vector<64x19xf32>, vector<19x512xf32>, vector<64x512xf32> -> vector<64x512xf32>
    %c0_3 = arith.constant 0 : index
    %c0_4 = arith.constant 0 : index
    %3 = vector.load %arg3[%c0_3, %c0_4] : memref<1x512xf32, #tpu.memory_space<vmem>>, vector<1x512xf32>
    %4 = vector.broadcast %3 : vector<1x512xf32> to vector<64x512xf32>
    %5 = arith.addf %2, %4 : vector<64x512xf32>
    %c0_5 = arith.constant 0 : index
    %c0_6 = arith.constant 0 : index
    %6 = vector.load %arg2[%c0_5, %c0_6] : memref<128x512xf32, #tpu.memory_space<vmem>>, vector<128x512xf32>
    %cst_7 = arith.constant 0.000000e+00 : f32
    %7 = vector.broadcast %cst_7 : f32 to vector<8x128xf32>
    %cst_8 = arith.constant 0.000000e+00 : f32
    %8 = vector.broadcast %cst_8 : f32 to vector<8x128xf32>
    %9 = vector.extract_strided_slice %5 {offsets = [0, 0], sizes = [8, 512], strides = [1, 1]} : vector<64x512xf32> to vector<8x512xf32>
    %cst_9 = arith.constant dense<0.000000e+00> : vector<8x512xf32>
    %10 = tpu.matmul %7, %6, %cst_9 {dimension_numbers = #tpu.dot_dimension_numbers<[1], [0], [0], [1], [0, 0, 1, 1], [], []>} : vector<8x128xf32>, vector<128x512xf32>, vector<8x512xf32> -> vector<8x512xf32>
    %11 = arith.addf %9, %10 : vector<8x512xf32>
    %12 = vector.extract_strided_slice %11 {offsets = [0, 0], sizes = [8, 128], strides = [1, 1]} : vector<8x512xf32> to vector<8x128xf32>
    %13 = arith.negf %12 : vector<8x128xf32>
    %14 = math.exp %13 : vector<8x128xf32>
    %cst_10 = arith.constant 1.000000e+00 : f32
    %15 = vector.broadcast %cst_10 : f32 to vector<8x128xf32>
    %16 = arith.addf %15, %14 : vector<8x128xf32>
    %17 = arith.divf %15, %16 : vector<8x128xf32>
    %18 = vector.extract_strided_slice %11 {offsets = [0, 128], sizes = [8, 128], strides = [1, 1]} : vector<8x512xf32> to vector<8x128xf32>
    %19 = arith.negf %18 : vector<8x128xf32>
    %20 = math.exp %19 : vector<8x128xf32>
    %cst_11 = arith.constant 1.000000e+00 : f32
    %21 = vector.broadcast %cst_11 : f32 to vector<8x128xf32>
    %22 = arith.addf %21, %20 : vector<8x128xf32>
    %23 = arith.divf %21, %22 : vector<8x128xf32>
    %24 = vector.extract_strided_slice %11 {offsets = [0, 256], sizes = [8, 128], strides = [1, 1]} : vector<8x512xf32> to vector<8x128xf32>
    %25 = math.tanh %24 : vector<8x128xf32>
    %26 = vector.extract_strided_slice %11 {offsets = [0, 384], sizes = [8, 128], strides = [1, 1]} : vector<8x512xf32> to vector<8x128xf32>
    %27 = arith.negf %26 : vector<8x128xf32>
    %28 = math.exp %27 : vector<8x128xf32>
    %cst_12 = arith.constant 1.000000e+00 : f32
    %29 = vector.broadcast %cst_12 : f32 to vector<8x128xf32>
    %30 = arith.addf %29, %28 : vector<8x128xf32>
    %31 = arith.divf %29, %30 : vector<8x128xf32>
    %32 = arith.mulf %23, %8 : vector<8x128xf32>
    %33 = arith.mulf %17, %25 : vector<8x128xf32>
    %34 = arith.addf %32, %33 : vector<8x128xf32>
    %35 = math.tanh %34 : vector<8x128xf32>
    %36 = arith.mulf %31, %35 : vector<8x128xf32>
    %37 = vector.extract_strided_slice %5 {offsets = [8, 0], sizes = [8, 512], strides = [1, 1]} : vector<64x512xf32> to vector<8x512xf32>
    %cst_13 = arith.constant dense<0.000000e+00> : vector<8x512xf32>
    %38 = tpu.matmul %36, %6, %cst_13 {dimension_numbers = #tpu.dot_dimension_numbers<[1], [0], [0], [1], [0, 0, 1, 1], [], []>} : vector<8x128xf32>, vector<128x512xf32>, vector<8x512xf32> -> vector<8x512xf32>
    %39 = arith.addf %37, %38 : vector<8x512xf32>
    %40 = vector.extract_strided_slice %39 {offsets = [0, 0], sizes = [8, 128], strides = [1, 1]} : vector<8x512xf32> to vector<8x128xf32>
    %41 = arith.negf %40 : vector<8x128xf32>
    %42 = math.exp %41 : vector<8x128xf32>
    %cst_14 = arith.constant 1.000000e+00 : f32
    %43 = vector.broadcast %cst_14 : f32 to vector<8x128xf32>
    %44 = arith.addf %43, %42 : vector<8x128xf32>
    %45 = arith.divf %43, %44 : vector<8x128xf32>
    %46 = vector.extract_strided_slice %39 {offsets = [0, 128], sizes = [8, 128], strides = [1, 1]} : vector<8x512xf32> to vector<8x128xf32>
    %47 = arith.negf %46 : vector<8x128xf32>
    %48 = math.exp %47 : vector<8x128xf32>
    %cst_15 = arith.constant 1.000000e+00 : f32
    %49 = vector.broadcast %cst_15 : f32 to vector<8x128xf32>
    %50 = arith.addf %49, %48 : vector<8x128xf32>
    %51 = arith.divf %49, %50 : vector<8x128xf32>
    %52 = vector.extract_strided_slice %39 {offsets = [0, 256], sizes = [8, 128], strides = [1, 1]} : vector<8x512xf32> to vector<8x128xf32>
    %53 = math.tanh %52 : vector<8x128xf32>
    %54 = vector.extract_strided_slice %39 {offsets = [0, 384], sizes = [8, 128], strides = [1, 1]} : vector<8x512xf32> to vector<8x128xf32>
    %55 = arith.negf %54 : vector<8x128xf32>
    %56 = math.exp %55 : vector<8x128xf32>
    %cst_16 = arith.constant 1.000000e+00 : f32
    %57 = vector.broadcast %cst_16 : f32 to vector<8x128xf32>
    %58 = arith.addf %57, %56 : vector<8x128xf32>
    %59 = arith.divf %57, %58 : vector<8x128xf32>
    %60 = arith.mulf %51, %34 : vector<8x128xf32>
    %61 = arith.mulf %45, %53 : vector<8x128xf32>
    %62 = arith.addf %60, %61 : vector<8x128xf32>
    %63 = math.tanh %62 : vector<8x128xf32>
    %64 = arith.mulf %59, %63 : vector<8x128xf32>
    %65 = vector.extract_strided_slice %5 {offsets = [16, 0], sizes = [8, 512], strides = [1, 1]} : vector<64x512xf32> to vector<8x512xf32>
    %cst_17 = arith.constant dense<0.000000e+00> : vector<8x512xf32>
    %66 = tpu.matmul %64, %6, %cst_17 {dimension_numbers = #tpu.dot_dimension_numbers<[1], [0], [0], [1], [0, 0, 1, 1], [], []>} : vector<8x128xf32>, vector<128x512xf32>, vector<8x512xf32> -> vector<8x512xf32>
    %67 = arith.addf %65, %66 : vector<8x512xf32>
    %68 = vector.extract_strided_slice %67 {offsets = [0, 0], sizes = [8, 128], strides = [1, 1]} : vector<8x512xf32> to vector<8x128xf32>
    %69 = arith.negf %68 : vector<8x128xf32>
    %70 = math.exp %69 : vector<8x128xf32>
    %cst_18 = arith.constant 1.000000e+00 : f32
    %71 = vector.broadcast %cst_18 : f32 to vector<8x128xf32>
    %72 = arith.addf %71, %70 : vector<8x128xf32>
    %73 = arith.divf %71, %72 : vector<8x128xf32>
    %74 = vector.extract_strided_slice %67 {offsets = [0, 128], sizes = [8, 128], strides = [1, 1]} : vector<8x512xf32> to vector<8x128xf32>
    %75 = arith.negf %74 : vector<8x128xf32>
    %76 = math.exp %75 : vector<8x128xf32>
    %cst_19 = arith.constant 1.000000e+00 : f32
    %77 = vector.broadcast %cst_19 : f32 to vector<8x128xf32>
    %78 = arith.addf %77, %76 : vector<8x128xf32>
    %79 = arith.divf %77, %78 : vector<8x128xf32>
    %80 = vector.extract_strided_slice %67 {offsets = [0, 256], sizes = [8, 128], strides = [1, 1]} : vector<8x512xf32> to vector<8x128xf32>
    %81 = math.tanh %80 : vector<8x128xf32>
    %82 = vector.extract_strided_slice %67 {offsets = [0, 384], sizes = [8, 128], strides = [1, 1]} : vector<8x512xf32> to vector<8x128xf32>
    %83 = arith.negf %82 : vector<8x128xf32>
    %84 = math.exp %83 : vector<8x128xf32>
    %cst_20 = arith.constant 1.000000e+00 : f32
    %85 = vector.broadcast %cst_20 : f32 to vector<8x128xf32>
    %86 = arith.addf %85, %84 : vector<8x128xf32>
    %87 = arith.divf %85, %86 : vector<8x128xf32>
    %88 = arith.mulf %79, %62 : vector<8x128xf32>
    %89 = arith.mulf %73, %81 : vector<8x128xf32>
    %90 = arith.addf %88, %89 : vector<8x128xf32>
    %91 = math.tanh %90 : vector<8x128xf32>
    %92 = arith.mulf %87, %91 : vector<8x128xf32>
    %93 = vector.extract_strided_slice %5 {offsets = [24, 0], sizes = [8, 512], strides = [1, 1]} : vector<64x512xf32> to vector<8x512xf32>
    %cst_21 = arith.constant dense<0.000000e+00> : vector<8x512xf32>
    %94 = tpu.matmul %92, %6, %cst_21 {dimension_numbers = #tpu.dot_dimension_numbers<[1], [0], [0], [1], [0, 0, 1, 1], [], []>} : vector<8x128xf32>, vector<128x512xf32>, vector<8x512xf32> -> vector<8x512xf32>
    %95 = arith.addf %93, %94 : vector<8x512xf32>
    %96 = vector.extract_strided_slice %95 {offsets = [0, 0], sizes = [8, 128], strides = [1, 1]} : vector<8x512xf32> to vector<8x128xf32>
    %97 = arith.negf %96 : vector<8x128xf32>
    %98 = math.exp %97 : vector<8x128xf32>
    %cst_22 = arith.constant 1.000000e+00 : f32
    %99 = vector.broadcast %cst_22 : f32 to vector<8x128xf32>
    %100 = arith.addf %99, %98 : vector<8x128xf32>
    %101 = arith.divf %99, %100 : vector<8x128xf32>
    %102 = vector.extract_strided_slice %95 {offsets = [0, 128], sizes = [8, 128], strides = [1, 1]} : vector<8x512xf32> to vector<8x128xf32>
    %103 = arith.negf %102 : vector<8x128xf32>
    %104 = math.exp %103 : vector<8x128xf32>
    %cst_23 = arith.constant 1.000000e+00 : f32
    %105 = vector.broadcast %cst_23 : f32 to vector<8x128xf32>
    %106 = arith.addf %105, %104 : vector<8x128xf32>
    %107 = arith.divf %105, %106 : vector<8x128xf32>
    %108 = vector.extract_strided_slice %95 {offsets = [0, 256], sizes = [8, 128], strides = [1, 1]} : vector<8x512xf32> to vector<8x128xf32>
    %109 = math.tanh %108 : vector<8x128xf32>
    %110 = vector.extract_strided_slice %95 {offsets = [0, 384], sizes = [8, 128], strides = [1, 1]} : vector<8x512xf32> to vector<8x128xf32>
    %111 = arith.negf %110 : vector<8x128xf32>
    %112 = math.exp %111 : vector<8x128xf32>
    %cst_24 = arith.constant 1.000000e+00 : f32
    %113 = vector.broadcast %cst_24 : f32 to vector<8x128xf32>
    %114 = arith.addf %113, %112 : vector<8x128xf32>
    %115 = arith.divf %113, %114 : vector<8x128xf32>
    %116 = arith.mulf %107, %90 : vector<8x128xf32>
    %117 = arith.mulf %101, %109 : vector<8x128xf32>
    %118 = arith.addf %116, %117 : vector<8x128xf32>
    %119 = math.tanh %118 : vector<8x128xf32>
    %120 = arith.mulf %115, %119 : vector<8x128xf32>
    %121 = vector.extract_strided_slice %5 {offsets = [32, 0], sizes = [8, 512], strides = [1, 1]} : vector<64x512xf32> to vector<8x512xf32>
    %cst_25 = arith.constant dense<0.000000e+00> : vector<8x512xf32>
    %122 = tpu.matmul %120, %6, %cst_25 {dimension_numbers = #tpu.dot_dimension_numbers<[1], [0], [0], [1], [0, 0, 1, 1], [], []>} : vector<8x128xf32>, vector<128x512xf32>, vector<8x512xf32> -> vector<8x512xf32>
    %123 = arith.addf %121, %122 : vector<8x512xf32>
    %124 = vector.extract_strided_slice %123 {offsets = [0, 0], sizes = [8, 128], strides = [1, 1]} : vector<8x512xf32> to vector<8x128xf32>
    %125 = arith.negf %124 : vector<8x128xf32>
    %126 = math.exp %125 : vector<8x128xf32>
    %cst_26 = arith.constant 1.000000e+00 : f32
    %127 = vector.broadcast %cst_26 : f32 to vector<8x128xf32>
    %128 = arith.addf %127, %126 : vector<8x128xf32>
    %129 = arith.divf %127, %128 : vector<8x128xf32>
    %130 = vector.extract_strided_slice %123 {offsets = [0, 128], sizes = [8, 128], strides = [1, 1]} : vector<8x512xf32> to vector<8x128xf32>
    %131 = arith.negf %130 : vector<8x128xf32>
    %132 = math.exp %131 : vector<8x128xf32>
    %cst_27 = arith.constant 1.000000e+00 : f32
    %133 = vector.broadcast %cst_27 : f32 to vector<8x128xf32>
    %134 = arith.addf %133, %132 : vector<8x128xf32>
    %135 = arith.divf %133, %134 : vector<8x128xf32>
    %136 = vector.extract_strided_slice %123 {offsets = [0, 256], sizes = [8, 128], strides = [1, 1]} : vector<8x512xf32> to vector<8x128xf32>
    %137 = math.tanh %136 : vector<8x128xf32>
    %138 = vector.extract_strided_slice %123 {offsets = [0, 384], sizes = [8, 128], strides = [1, 1]} : vector<8x512xf32> to vector<8x128xf32>
    %139 = arith.negf %138 : vector<8x128xf32>
    %140 = math.exp %139 : vector<8x128xf32>
    %cst_28 = arith.constant 1.000000e+00 : f32
    %141 = vector.broadcast %cst_28 : f32 to vector<8x128xf32>
    %142 = arith.addf %141, %140 : vector<8x128xf32>
    %143 = arith.divf %141, %142 : vector<8x128xf32>
    %144 = arith.mulf %135, %118 : vector<8x128xf32>
    %145 = arith.mulf %129, %137 : vector<8x128xf32>
    %146 = arith.addf %144, %145 : vector<8x128xf32>
    %147 = math.tanh %146 : vector<8x128xf32>
    %148 = arith.mulf %143, %147 : vector<8x128xf32>
    %149 = vector.extract_strided_slice %5 {offsets = [40, 0], sizes = [8, 512], strides = [1, 1]} : vector<64x512xf32> to vector<8x512xf32>
    %cst_29 = arith.constant dense<0.000000e+00> : vector<8x512xf32>
    %150 = tpu.matmul %148, %6, %cst_29 {dimension_numbers = #tpu.dot_dimension_numbers<[1], [0], [0], [1], [0, 0, 1, 1], [], []>} : vector<8x128xf32>, vector<128x512xf32>, vector<8x512xf32> -> vector<8x512xf32>
    %151 = arith.addf %149, %150 : vector<8x512xf32>
    %152 = vector.extract_strided_slice %151 {offsets = [0, 0], sizes = [8, 128], strides = [1, 1]} : vector<8x512xf32> to vector<8x128xf32>
    %153 = arith.negf %152 : vector<8x128xf32>
    %154 = math.exp %153 : vector<8x128xf32>
    %cst_30 = arith.constant 1.000000e+00 : f32
    %155 = vector.broadcast %cst_30 : f32 to vector<8x128xf32>
    %156 = arith.addf %155, %154 : vector<8x128xf32>
    %157 = arith.divf %155, %156 : vector<8x128xf32>
    %158 = vector.extract_strided_slice %151 {offsets = [0, 128], sizes = [8, 128], strides = [1, 1]} : vector<8x512xf32> to vector<8x128xf32>
    %159 = arith.negf %158 : vector<8x128xf32>
    %160 = math.exp %159 : vector<8x128xf32>
    %cst_31 = arith.constant 1.000000e+00 : f32
    %161 = vector.broadcast %cst_31 : f32 to vector<8x128xf32>
    %162 = arith.addf %161, %160 : vector<8x128xf32>
    %163 = arith.divf %161, %162 : vector<8x128xf32>
    %164 = vector.extract_strided_slice %151 {offsets = [0, 256], sizes = [8, 128], strides = [1, 1]} : vector<8x512xf32> to vector<8x128xf32>
    %165 = math.tanh %164 : vector<8x128xf32>
    %166 = vector.extract_strided_slice %151 {offsets = [0, 384], sizes = [8, 128], strides = [1, 1]} : vector<8x512xf32> to vector<8x128xf32>
    %167 = arith.negf %166 : vector<8x128xf32>
    %168 = math.exp %167 : vector<8x128xf32>
    %cst_32 = arith.constant 1.000000e+00 : f32
    %169 = vector.broadcast %cst_32 : f32 to vector<8x128xf32>
    %170 = arith.addf %169, %168 : vector<8x128xf32>
    %171 = arith.divf %169, %170 : vector<8x128xf32>
    %172 = arith.mulf %163, %146 : vector<8x128xf32>
    %173 = arith.mulf %157, %165 : vector<8x128xf32>
    %174 = arith.addf %172, %173 : vector<8x128xf32>
    %175 = math.tanh %174 : vector<8x128xf32>
    %176 = arith.mulf %171, %175 : vector<8x128xf32>
    %177 = vector.extract_strided_slice %5 {offsets = [48, 0], sizes = [8, 512], strides = [1, 1]} : vector<64x512xf32> to vector<8x512xf32>
    %cst_33 = arith.constant dense<0.000000e+00> : vector<8x512xf32>
    %178 = tpu.matmul %176, %6, %cst_33 {dimension_numbers = #tpu.dot_dimension_numbers<[1], [0], [0], [1], [0, 0, 1, 1], [], []>} : vector<8x128xf32>, vector<128x512xf32>, vector<8x512xf32> -> vector<8x512xf32>
    %179 = arith.addf %177, %178 : vector<8x512xf32>
    %180 = vector.extract_strided_slice %179 {offsets = [0, 0], sizes = [8, 128], strides = [1, 1]} : vector<8x512xf32> to vector<8x128xf32>
    %181 = arith.negf %180 : vector<8x128xf32>
    %182 = math.exp %181 : vector<8x128xf32>
    %cst_34 = arith.constant 1.000000e+00 : f32
    %183 = vector.broadcast %cst_34 : f32 to vector<8x128xf32>
    %184 = arith.addf %183, %182 : vector<8x128xf32>
    %185 = arith.divf %183, %184 : vector<8x128xf32>
    %186 = vector.extract_strided_slice %179 {offsets = [0, 128], sizes = [8, 128], strides = [1, 1]} : vector<8x512xf32> to vector<8x128xf32>
    %187 = arith.negf %186 : vector<8x128xf32>
    %188 = math.exp %187 : vector<8x128xf32>
    %cst_35 = arith.constant 1.000000e+00 : f32
    %189 = vector.broadcast %cst_35 : f32 to vector<8x128xf32>
    %190 = arith.addf %189, %188 : vector<8x128xf32>
    %191 = arith.divf %189, %190 : vector<8x128xf32>
    %192 = vector.extract_strided_slice %179 {offsets = [0, 256], sizes = [8, 128], strides = [1, 1]} : vector<8x512xf32> to vector<8x128xf32>
    %193 = math.tanh %192 : vector<8x128xf32>
    %194 = vector.extract_strided_slice %179 {offsets = [0, 384], sizes = [8, 128], strides = [1, 1]} : vector<8x512xf32> to vector<8x128xf32>
    %195 = arith.negf %194 : vector<8x128xf32>
    %196 = math.exp %195 : vector<8x128xf32>
    %cst_36 = arith.constant 1.000000e+00 : f32
    %197 = vector.broadcast %cst_36 : f32 to vector<8x128xf32>
    %198 = arith.addf %197, %196 : vector<8x128xf32>
    %199 = arith.divf %197, %198 : vector<8x128xf32>
    %200 = arith.mulf %191, %174 : vector<8x128xf32>
    %201 = arith.mulf %185, %193 : vector<8x128xf32>
    %202 = arith.addf %200, %201 : vector<8x128xf32>
    %203 = math.tanh %202 : vector<8x128xf32>
    %204 = arith.mulf %199, %203 : vector<8x128xf32>
    %205 = vector.extract_strided_slice %5 {offsets = [56, 0], sizes = [8, 512], strides = [1, 1]} : vector<64x512xf32> to vector<8x512xf32>
    %cst_37 = arith.constant dense<0.000000e+00> : vector<8x512xf32>
    %206 = tpu.matmul %204, %6, %cst_37 {dimension_numbers = #tpu.dot_dimension_numbers<[1], [0], [0], [1], [0, 0, 1, 1], [], []>} : vector<8x128xf32>, vector<128x512xf32>, vector<8x512xf32> -> vector<8x512xf32>
    %207 = arith.addf %205, %206 : vector<8x512xf32>
    %208 = vector.extract_strided_slice %207 {offsets = [0, 0], sizes = [8, 128], strides = [1, 1]} : vector<8x512xf32> to vector<8x128xf32>
    %209 = arith.negf %208 : vector<8x128xf32>
    %210 = math.exp %209 : vector<8x128xf32>
    %cst_38 = arith.constant 1.000000e+00 : f32
    %211 = vector.broadcast %cst_38 : f32 to vector<8x128xf32>
    %212 = arith.addf %211, %210 : vector<8x128xf32>
    %213 = arith.divf %211, %212 : vector<8x128xf32>
    %214 = vector.extract_strided_slice %207 {offsets = [0, 128], sizes = [8, 128], strides = [1, 1]} : vector<8x512xf32> to vector<8x128xf32>
    %215 = arith.negf %214 : vector<8x128xf32>
    %216 = math.exp %215 : vector<8x128xf32>
    %cst_39 = arith.constant 1.000000e+00 : f32
    %217 = vector.broadcast %cst_39 : f32 to vector<8x128xf32>
    %218 = arith.addf %217, %216 : vector<8x128xf32>
    %219 = arith.divf %217, %218 : vector<8x128xf32>
    %220 = vector.extract_strided_slice %207 {offsets = [0, 256], sizes = [8, 128], strides = [1, 1]} : vector<8x512xf32> to vector<8x128xf32>
    %221 = math.tanh %220 : vector<8x128xf32>
    %222 = vector.extract_strided_slice %207 {offsets = [0, 384], sizes = [8, 128], strides = [1, 1]} : vector<8x512xf32> to vector<8x128xf32>
    %223 = arith.negf %222 : vector<8x128xf32>
    %224 = math.exp %223 : vector<8x128xf32>
    %cst_40 = arith.constant 1.000000e+00 : f32
    %225 = vector.broadcast %cst_40 : f32 to vector<8x128xf32>
    %226 = arith.addf %225, %224 : vector<8x128xf32>
    %227 = arith.divf %225, %226 : vector<8x128xf32>
    %228 = arith.mulf %219, %202 : vector<8x128xf32>
    %229 = arith.mulf %213, %221 : vector<8x128xf32>
    %230 = arith.addf %228, %229 : vector<8x128xf32>
    %231 = math.tanh %230 : vector<8x128xf32>
    %232 = arith.mulf %227, %231 : vector<8x128xf32>
    %c0_41 = arith.constant 0 : index
    %c0_42 = arith.constant 0 : index
    %233 = vector.load %arg4[%c0_41, %c0_42] : memref<128x128xf32, #tpu.memory_space<vmem>>, vector<128x128xf32>
    %cst_43 = arith.constant dense<0.000000e+00> : vector<8x128xf32>
    %234 = tpu.matmul %232, %233, %cst_43 {dimension_numbers = #tpu.dot_dimension_numbers<[1], [0], [0], [1], [0, 0, 1, 1], [], []>} : vector<8x128xf32>, vector<128x128xf32>, vector<8x128xf32> -> vector<8x128xf32>
    %c0_44 = arith.constant 0 : index
    %c0_45 = arith.constant 0 : index
    %235 = vector.load %arg5[%c0_44, %c0_45] : memref<1x128xf32, #tpu.memory_space<vmem>>, vector<1x128xf32>
    %236 = vector.broadcast %235 : vector<1x128xf32> to vector<8x128xf32>
    %237 = arith.addf %234, %236 : vector<8x128xf32>
    %c0_46 = arith.constant 0 : index
    %c0_47 = arith.constant 0 : index
    %238 = vector.load %arg6[%c0_46, %c0_47] : memref<8x128xf32, #tpu.memory_space<vmem>>, vector<8x128xf32>
    tpu.vector_store %arg6[%c0_46, %c0_47], %237 {strides = array<i32>} : memref<8x128xf32, #tpu.memory_space<vmem>>, vector<8x128xf32>,
    return
  }
}

</mosaic_0001>

<bundles_post_ra>
// kernel: lstm_classifier_forward.1
= control target key start
LH: loop header
LB: loop body
LE: loop exit
PB: predicated region body
PF: predicated region fallthrough
CT: control target
= control target key end

     0   :  { %11 = vsyncpa [#allocation3], 0  ;;  %s2969_s0 = inlined_call_operand.vmem [shape: f32[64,19], index: 0, kind: input, shape index: {}]   ;;  %s2970_s1 = inlined_call_operand.vmem [shape: f32[19,512], index: 1, kind: input, shape index: {}]   ;;  %s2971_s2 = inlined_call_operand.hbm [shape: f32[128,512], index: 2, kind: input, shape index: {}]   ;;  %s2972_s3 = inlined_call_operand.vmem [shape: f32[1,512], index: 3, kind: input, shape index: {}]   ;;  %s2973_s4 = inlined_call_operand.hbm [shape: f32[128,128], index: 4, kind: input, shape index: {}]   ;;  %s2974_s5 = inlined_call_operand.vmem [shape: f32[1,128], index: 5, kind: input, shape index: {}]   ;;  %s2975_s6 = inlined_call_operand.vmem [shape: f32[8,128], index: 6, kind: output, shape index: {}]  }
   0x1   :  { %s21_s23 = sshll.u32 %s2971_s2, 4  ;;  %s22_s23 = int_to_ptr.hbm [resolvable:$true] %s21_s23 }
   0x2   :  { %12 = vsyncpa [#allocation5], 0  ;;  %s1895_s24 = smov [#allocation2]   ;;  %s36_s28 = sshll.u32 %s2973_s4, 4  ;;  %s37_s28 = int_to_ptr.hbm [resolvable:$true] %s36_s28 }
   0x3   :  { %s23_s25 = sshll.u32 %s1895_s24, 4  ;;  %s1896_s29 = smov 512   ;;  %s24_s25 = int_to_ptr.vmem [resolvable:$true] %s23_s25 }
   0x4   :  { %s1897_s30 = smov 32   ;;  %s1898_s7 = smov [#allocation4]  }
   0x5   :  { %29 = dma.hbm_to_vmem [thread:$0]  %s22_s23, 8192, %s24_s25, [#allocation3], %s1896_s29, %s1896_s29, %s1897_s30  }
   0x6   :  { %s38_s8 = sshll.u32 %s1898_s7, 4  ;;  %s1899_s9 = smov 128   ;;  %s39_s8 = int_to_ptr.vmem [resolvable:$true] %s38_s8 }
   0x7   :  { %s1900_s10 = smov 8  }
   0x8   :  { %44 = dma.hbm_to_vmem [thread:$0]  %s37_s28, 2048, %s39_s8, [#allocation5], %s1899_s9, %s1899_s9, %s1900_s10  }
   0x9   :  { %1891 = dma.done.wait [#allocation3], 8192  }
   0xa   :  { %1892 = vsyncadd [#allocation3], 4294959104 }
   0xb   :  { %1893 = dma.done.wait [#allocation5], 2048  }
   0xc   :  { %1894 = vsyncadd [#allocation5], 4294965248  ;;  %vm110_vm0 = vcmask 1042432   ;;  %v71_v0 = vld [vmem:[%s2970_s1 + $0x40] sm:$0x7]  ;;  %vm85_vm1 = vcmask 154624  }
   0xd   :  { %v67_v1 = vld [vmem:[%s2970_s1 + $0x20] sm:$0xff]  ;;  %1574 = vmatpush.msk.msra.mxu0 %vm110_vm0, %v71_v0  ;;  %1634 = vmatpush.msk.msra.mxu1 %vm110_vm0, %v71_v0  ;;  %v1962_v4 = vld [vmem:[%s2969_s0 + $0x28] sm:$0xff]  ;;  %v1967_v5 = vld [vmem:[%s2969_s0 + $0x30] sm:$0xff] }
   0xe   :  { %1635 = vmatpush.msk.msra.mxu2 %vm110_vm0, %v71_v0  ;;  %1636 = vmatpush.msk.msra.mxu3 %vm110_vm0, %v71_v0  ;;  %v63_v2 = vld [vmem:[%s2970_s1] sm:$0xff]  ;;  %v1972_v6 = vld [vmem:[%s2969_s0 + $0x38] sm:$0xff]  ;;  %v72_v7 = vld [vmem:[%s2970_s1 + $0x48] sm:$0x7] }
   0xf   :  { %137 = vmatpush.msra.mxu0 %v67_v1  ;;  %1637 = vmatpush.msra.mxu1 %v67_v1  ;;  %v55_v3 = vld [vmem:[%s2969_s0] sm:$0xff]  ;;  %v73_v8 = vld [vmem:[%s2970_s1 + $0x50] sm:$0x7]  ;;  %v74_v9 = vld [vmem:[%s2970_s1 + $0x58] sm:$0x7] }
  0x10   :  { %1638 = vmatpush.msra.mxu2 %v67_v1  ;;  %1639 = vmatpush.msra.mxu3 %v67_v1  ;;  %v1986_v10 = vld [vmem:[#allocation2 + $0x1e0] sm:$0xff]  ;;  %v68_v11 = vld [vmem:[%s2970_s1 + $0x28] sm:$0xff]  ;;  %v69_v12 = vld [vmem:[%s2970_s1 + $0x30] sm:$0xff] }
  0x11   :  { %138 = vmatpush.msra.mxu0 %v63_v2  ;;  %1640 = vmatpush.msra.mxu1 %v63_v2  ;;  %3074 = vst [vmem:[#allocation8_spill] sm:$0xff] %v1986_v10  ;;  %v70_v13 = vld [vmem:[%s2970_s1 + $0x38] sm:$0xff]  ;;  %v2003_v14 = vld [vmem:[#allocation2 + $0x1c0] sm:$0xff]  ;;  %v64_v15 = vld [vmem:[%s2970_s1 + $0x8] sm:$0xff] }
  0x12   :  { %1641 = vmatpush.msra.mxu2 %v63_v2  ;;  %1642 = vmatpush.msra.mxu3 %v63_v2  ;;  %v65_v16 = vld [vmem:[%s2970_s1 + $0x10] sm:$0xff]  ;;  %v66_v17 = vld [vmem:[%s2970_s1 + $0x18] sm:$0xff]  ;;  %v2016_v18 = vld [vmem:[#allocation2 + $0x1e8] sm:$0xff] }
  0x13   :  { %1575 = vmatmul.msk.f32.vlgmr.msra.gmra.mxu0 %vm85_vm1, %v55_v3  ;;  %1580 = vmatmul.msk.f32.vlgmr.msra.gmra.mxu1 %vm85_vm1, %v1962_v4  ;;  %v56_v19 = vld [vmem:[%s2969_s0 + $0x8] sm:$0xff]  ;;  %v2025_v21 = vld [vmem:[#allocation2 + $0x1a0] sm:$0xff]  ;;  %v2029_v22 = vld [vmem:[#allocation2 + $0x1f8] sm:$0xff] }
  0x14   :  { %1581 = vmatmul.msk.f32.vlgmr.msra.gmra.mxu2 %vm85_vm1, %v1967_v5  ;;  %1582 = vmatmul.msk.f32.vlgmr.msra.gmra.mxu3 %vm85_vm1, %v1972_v6  ;;  %v2023_v20 = vld [vmem:[#allocation2 + $0x1c8] sm:$0xff]  ;;  %v2031_v23 = vld [vmem:[#allocation2 + $0x1f0] sm:$0xff]  ;;  %v2035_v24 = vld [vmem:[#allocation2 + $0x180] sm:$0xff] }
  0x15   :  { %1583 = vmatpush.msk.msrb.mxu1 %vm110_vm0, %v72_v7  ;;  %1592 = vmatpush.msk.msrb.mxu2 %vm110_vm0, %v73_v8  ;;  %v2037_v25 = vld [vmem:[#allocation2 + $0x1a8] sm:$0xff]  ;;  %v2041_v26 = vld [vmem:[#allocation2 + $0x1d8] sm:$0xff]  ;;  %v2043_v27 = vld [vmem:[#allocation2 + $0x1d0] sm:$0xff] }
  0x16   :  { %1601 = vmatpush.msk.msrb.mxu3 %vm110_vm0, %v74_v9  ;;  %351 = vmatpush.msrb.mxu0 %v1986_v10  ;;  %v2046_v28 = vld [vmem:[#allocation2 + $0x160] sm:$0xff]  ;;  %v2048_v29 = vld [vmem:[#allocation2 + $0x188] sm:$0xff]  ;;  %v2053_v30 = vld [vmem:[#allocation2 + $0x1b8] sm:$0xff] }
  0x17   :  { %178 = vmatpush.msrb.mxu1 %v68_v11  ;;  %219 = vmatpush.msrb.mxu2 %v69_v12  ;;  %v2055_v31 = vld [vmem:[#allocation2 + $0x1b0] sm:$0xff]  ;;  %v2064_v33 = vld [vmem:[#allocation2 + $0x140] sm:$0xff]  ;;  %v2067_v34 = vld [vmem:[#allocation2 + $0x168] sm:$0xff] }
  0x18   :  { %260 = vmatpush.msrb.mxu3 %v70_v13  ;;  %352 = vmatpush.msrb.mxu0 %v2003_v14  ;;  %v57_v32 = vld [vmem:[%s2969_s0 + $0x10] sm:$0xff]  ;;  %v2072_v35 = vld [vmem:[#allocation2 + $0x198] sm:$0xff]  ;;  %v2078_v37 = vld [vmem:[#allocation2 + $0x120] sm:$0xff] }
  0x19   :  { %179 = vmatpush.msrb.mxu1 %v64_v15  ;;  %220 = vmatpush.msrb.mxu2 %v65_v16  ;;  %v2074_v36 = vld [vmem:[#allocation2 + $0x190] sm:$0xff]  ;;  %v2080_v38 = vld [vmem:[#allocation2 + $0x148] sm:$0xff]  ;;  %v2084_v39 = vld [vmem:[#allocation2 + $0x178] sm:$0xff]  ;;  %v2978_v16 = vmov 0.0  }
  0x1a   :  { %261 = vmatpush.msrb.mxu3 %v66_v17  ;;  %353 = vmatpush.msrb.mxu0 %v2025_v21  ;;  %v2086_v40 = vld [vmem:[#allocation2 + $0x170] sm:$0xff]  ;;  %v2088_v41 = vld [vmem:[#allocation2 + $0x100] sm:$0xff]  ;;  %v2091_v42 = vld [vmem:[#allocation2 + $0x128] sm:$0xff] }
  0x1b   :  { %371 = vmatpush.msra.mxu1 %v2016_v18  ;;  %1576 = vmatmul.msk.f32.gmra.mxu0 %vm85_vm1, %v56_v19  ;;  %v2096_v43 = vld [vmem:[#allocation2 + $0x158] sm:$0xff]  ;;  %v2098_v44 = vld [vmem:[#allocation2 + $0x150] sm:$0xff]  ;;  %v2107_v46 = vld [vmem:[#allocation2 + $0xe0] sm:$0xff] }
  0x1c   :  { %1584 = vmatmul.msk.f32.vlgmr.msrb.gmra.mxu1 %vm85_vm1, %v55_v3  ;;  %1593 = vmatmul.msk.f32.vlgmr.msrb.gmra.mxu2 %vm85_vm1, %v55_v3  ;;  %v58_v45 = vld [vmem:[%s2969_s0 + $0x18] sm:$0xff]  ;;  %v2110_v47 = vld [vmem:[#allocation2 + $0x108] sm:$0xff]  ;;  %v2117_v49 = vld [vmem:[#allocation2 + $0x130] sm:$0xff] }
  0x1d   :  { %1602 = vmatmul.msk.f32.vlgmr.msrb.gmra.mxu3 %vm85_vm1, %v55_v3  ;;  %372 = vmatpush.msra.mxu1 %v2023_v20  ;;  %v2115_v48 = vld [vmem:[#allocation2 + $0x138] sm:$0xff]  ;;  %v2121_v50 = vld [vmem:[#allocation2 + $0xc0] sm:$0xff]  ;;  %v2123_v51 = vld [vmem:[#allocation2 + $0xe8] sm:$0xff] }
  0x1e   :  { %411 = vmatpush.msra.mxu3 %v2029_v22  ;;  %391 = vmatpush.msra.mxu2 %v2031_v23  ;;  %v2127_v52 = vld [vmem:[#allocation2 + $0x118] sm:$0xff]  ;;  %v2129_v53 = vld [vmem:[#allocation2 + $0x110] sm:$0xff]  ;;  %v2131_v54 = vld [vmem:[#allocation2 + $0xa0] sm:$0xff] }
  0x1f   :  { %354 = vmatpush.msrb.mxu0 %v2035_v24  ;;  %373 = vmatpush.msra.mxu1 %v2037_v25  ;;  %3075 = vst [vmem:[#allocation9_spill] sm:$0xff] %v2131_v54  ;;  %v2134_v55 = vld [vmem:[#allocation2 + $0xc8] sm:$0xff]  ;;  %v2139_v56 = vld [vmem:[#allocation2 + $0xf8] sm:$0xff]  ;;  %v2141_v57 = vld [vmem:[#allocation2 + $0xf0] sm:$0xff] }
  0x20   :  { %412 = vmatpush.msra.mxu3 %v2041_v26  ;;  %392 = vmatpush.msra.mxu2 %v2043_v27  ;;  %v2143_v58 = vld [vmem:[#allocation2 + $0x80] sm:$0xff]  ;;  %v2158_v61 = vld [vmem:[#allocation2 + $0xa8] sm:$0xff]  ;;  %v2160_v62 = vld [vmem:[#allocation2 + $0xd8] sm:$0xff] }
  0x21   :  { %355 = vmatpush.msrb.mxu0 %v2046_v28  ;;  %374 = vmatpush.msra.mxu1 %v2048_v29  ;;  %3076 = vst [vmem:[#allocation10_spill] sm:$0xff] %v2143_v58  ;;  %v59_v59 = vld [vmem:[%s2969_s0 + $0x20] sm:$0xff]  ;;  %v2166_v0 = vld [vmem:[#allocation2 + $0xd0] sm:$0xff]  ;;  %v2170_v1 = vld [vmem:[#allocation2 + $0x88] sm:$0xff] }
  0x22   :  { %413 = vmatpush.msra.mxu3 %v2053_v30  ;;  %393 = vmatpush.msra.mxu2 %v2055_v31  ;;  %v2152_v60 = vld [vmem:[#allocation2 + $0x60] sm:$0xff]  ;;  %3078 = vst [vmem:[#allocation12_spill] sm:$0xff] %v2158_v61  ;;  %v2172_v2 = vld [vmem:[#allocation2 + $0xb8] sm:$0xff]  ;;  %v2178_v7 = vld [vmem:[#allocation2 + $0xb0] sm:$0xff] }
  0x23   :  { %1577 = vmatmul.msk.f32.gmra.mxu0 %vm85_vm1, %v57_v32  ;;  %375 = vmatpush.msra.mxu1 %v2067_v34  ;;  %3077 = vst [vmem:[#allocation11_spill] sm:$0xff] %v2152_v60  ;;  %v2164_v63 = vld [vmem:[#allocation2 + $0x40] sm:$0xff]  ;;  %v2181_v8 = vld [vmem:[#allocation2 + $0x68] sm:$0xff]  ;;  %v2183_v9 = vld [vmem:[#allocation2 + $0x98] sm:$0xff] }
  0x24   :  { %1585 = vmatmul.msk.f32.gmra.mxu1 %vm85_vm1, %v56_v19  ;;  %1594 = vmatmul.msk.f32.gmra.mxu2 %vm85_vm1, %v56_v19  ;;  %3079 = vst [vmem:[#allocation13_spill] sm:$0xff] %v2160_v62  ;;  %v2174_v3 = vld [vmem:[#allocation2 + $0x20] sm:$0xff]  ;;  %v2194_v12 = vld [vmem:[#allocation2 + $0x48] sm:$0xff]  ;;  %v2198_v13 = vld [vmem:[#allocation2 + $0x78] sm:$0xff] }
  0x25   :  { %1603 = vmatmul.msk.f32.gmra.mxu3 %vm85_vm1, %v56_v19  ;;  %356 = vmatpush.msrb.mxu0 %v2064_v33  ;;  %3080 = vst [vmem:[#allocation14_spill] sm:$0xff] %v2164_v63  ;;  %v2186_v11 = vld [vmem:[#allocation2] sm:$0xff]  ;;  %v2200_v15 = vld [vmem:[#allocation2 + $0x90] sm:$0xff]  ;;  %v2204_v17 = vld [vmem:[#allocation2 + $0x28] sm:$0xff] }
  0x26   :  { %414 = vmatpush.msra.mxu3 %v2072_v35  ;;  %394 = vmatpush.msra.mxu2 %v2074_v36  ;;  %3081 = vst [vmem:[#allocation15_spill] sm:$0xff] %v2170_v1  ;;  %v2208_v19 = vld [vmem:[#allocation2 + $0x70] sm:$0xff] }
  0x27   :  { %357 = vmatpush.msrb.mxu0 %v2078_v37  ;;  %376 = vmatpush.msra.mxu1 %v2080_v38  ;;  %3082 = vst [vmem:[#allocation16_spill] sm:$0xff] %v2172_v2 }
  0x28   :  { %415 = vmatpush.msra.mxu3 %v2084_v39  ;;  %395 = vmatpush.msra.mxu2 %v2086_v40  ;;  %3083 = vst [vmem:[#allocation17_spill] sm:$0xff] %v2174_v3 }
  0x29   :  { %358 = vmatpush.msrb.mxu0 %v2088_v41  ;;  %377 = vmatpush.msra.mxu1 %v2091_v42  ;;  %3084 = vst [vmem:[#allocation18_spill] sm:$0xff] %v2178_v7 }
  0x2a   :  { %416 = vmatpush.msra.mxu3 %v2096_v43  ;;  %396 = vmatpush.msra.mxu2 %v2098_v44  ;;  %3085 = vst [vmem:[#allocation19_spill] sm:$0xff] %v2181_v8 }
  0x2b   :  { %1578 = vmatmul.msk.f32.gmra.mxu0 %vm85_vm1, %v58_v45  ;;  %378 = vmatpush.msra.mxu1 %v2110_v47  ;;  %3086 = vst [vmem:[#allocation20_spill] sm:$0xff] %v2183_v9 }
  0x2c   :  { %1586 = vmatmul.msk.f32.gmra.mxu1 %vm85_vm1, %v57_v32  ;;  %1595 = vmatmul.msk.f32.gmra.mxu2 %vm85_vm1, %v57_v32  ;;  %3087 = vst [vmem:[#allocation21_spill] sm:$0xff] %v2186_v11 }
  0x2d   :  { %1604 = vmatmul.msk.f32.gmra.mxu3 %vm85_vm1, %v57_v32  ;;  %359 = vmatpush.msrb.mxu0 %v2107_v46  ;;  %3088 = vst [vmem:[#allocation22_spill] sm:$0xff] %v2194_v12  ;;  %v2210_v32 = vld [vmem:[#allocation2 + $0x58] sm:$0xff] }
  0x2e   :  { %417 = vmatpush.msra.mxu3 %v2115_v48  ;;  %397 = vmatpush.msra.mxu2 %v2117_v49  ;;  %3089 = vst [vmem:[#allocation23_spill] sm:$0xff] %v2198_v13 }
  0x2f   :  { %360 = vmatpush.msrb.mxu0 %v2121_v50  ;;  %379 = vmatpush.msra.mxu1 %v2123_v51  ;;  %3090 = vst [vmem:[#allocation24_spill] sm:$0xff] %v2200_v15 }
  0x30   :  { %418 = vmatpush.msra.mxu3 %v2127_v52  ;;  %398 = vmatpush.msra.mxu2 %v2129_v53  ;;  %3091 = vst [vmem:[#allocation25_spill] sm:$0xff] %v2204_v17 }
  0x31   :  { %361 = vmatpush.msrb.mxu0 %v2131_v54  ;;  %380 = vmatpush.msra.mxu1 %v2134_v55  ;;  %3092 = vst [vmem:[#allocation26_spill] sm:$0xff] %v2208_v19 }
  0x32   :  { %419 = vmatpush.msra.mxu3 %v2139_v56  ;;  %399 = vmatpush.msra.mxu2 %v2141_v57  ;;  %3093 = vst [vmem:[#allocation27_spill] sm:$0xff] %v2210_v32 }
  0x33   :  { %362 = vmatpush.msrb.mxu0 %v2143_v58  ;;  %381 = vmatpush.msra.mxu1 %v2158_v61 }
  0x34   :  { %1587 = vmatmul.msk.f32.gmra.mxu1 %vm85_vm1, %v58_v45  ;;  %1579 = vmatmul.msk.f32.gmra.mxu0 %vm85_vm1, %v59_v59 }
  0x35   :  { %1596 = vmatmul.msk.f32.gmra.mxu2 %vm85_vm1, %v58_v45  ;;  %1605 = vmatmul.msk.f32.gmra.mxu3 %vm85_vm1, %v58_v45  ;;  %v2214_v45 = vld [vmem:[#allocation2 + $0x8] sm:$0xff] }
  0x36   :  { %363 = vmatpush.msrb.mxu0 %v2152_v60  ;;  %420 = vmatpush.msra.mxu3 %v2160_v62  ;;  %3094 = vst [vmem:[#allocation28_spill] sm:$0xff] %v2214_v45 }
  0x37   :  { %400 = vmatpush.msra.mxu2 %v2166_v0  ;;  %382 = vmatpush.msra.mxu1 %v2170_v1 }
  0x38   :  { %364 = vmatpush.msrb.mxu0 %v2164_v63  ;;  %421 = vmatpush.msra.mxu3 %v2172_v2 }
  0x39   :  { %401 = vmatpush.msra.mxu2 %v2178_v7  ;;  %383 = vmatpush.msra.mxu1 %v2181_v8 }
  0x3a   :  { %365 = vmatpush.msrb.mxu0 %v2174_v3  ;;  %422 = vmatpush.msra.mxu3 %v2183_v9  ;;  %v2229_v3 = vld [vmem:[#allocation2 + $0x30] sm:$0xff] }
  0x3b   :  { %384 = vmatpush.msra.mxu1 %v2194_v12  ;;  %402 = vmatpush.msra.mxu2 %v2200_v15  ;;  %3098 = vst [vmem:[#allocation32_spill] sm:$0xff] %v2229_v3 }
  0x3c   :  { %366 = vmatpush.msrb.mxu0 %v2186_v11  ;;  %1588 = vmatmul.msk.f32.gmra.mxu1 %vm85_vm1, %v59_v59  ;;  %v2217_v11 = vld [vmem:[#allocation2 + $0x50] sm:$0xff] }
  0x3d   :  { %1597 = vmatmul.msk.f32.gmra.mxu2 %vm85_vm1, %v59_v59  ;;  %367 = vmatmul.f32.vlgmr.msrb.gmra.mxu0 %v2978_v16  ;;  %3095 = vst [vmem:[#allocation29_spill] sm:$0xff] %v2217_v11  ;;  %v2219_v16 = vld [vmem:[#allocation2 + $0x38] sm:$0xff] }
  0x3e   :  { %1606 = vmatmul.msk.f32.gmra.mxu3 %vm85_vm1, %v59_v59  ;;  %385 = vmatpush.msra.mxu1 %v2204_v17  ;;  %3096 = vst [vmem:[#allocation30_spill] sm:$0xff] %v2219_v16  ;;  %v2225_v59 = vld [vmem:[#allocation2 + $0x18] sm:$0xff] }
  0x3f   :  { %423 = vmatpush.msra.mxu3 %v2198_v13  ;;  %498 = vmatpush.msra.mxu0 %v1986_v10  ;;  %3097 = vst [vmem:[#allocation31_spill] sm:$0xff] %v2225_v59  ;;  %v2237_v10 = vld [vmem:[#allocation2 + $0x10] sm:$0xff] }
  0x40   :  { %403 = vmatpush.msra.mxu2 %v2208_v19  ;;  %386 = vmatpush.msra.mxu1 %v2214_v45  ;;  %3099 = vst [vmem:[#allocation33_spill] sm:$0xff] %v2237_v10 }
  0x41   :  { %424 = vmatpush.msra.mxu3 %v2210_v32  ;;  %499 = vmatpush.msra.mxu0 %v2003_v14 }
  0x42   :  { %404 = vmatpush.msra.mxu2 %v2217_v11  ;;  %518 = vmatpush.msrb.mxu1 %v2016_v18 }
  0x43   :  { %425 = vmatpush.msra.mxu3 %v2219_v16  ;;  %500 = vmatpush.msra.mxu0 %v2025_v21 }
  0x44   :  { %1589 = vmatmul.msk.f32.gmra.mxu1 %vm85_vm1, %v1962_v4  ;;  %405 = vmatpush.msra.mxu2 %v2229_v3 }
  0x45   :  { %1598 = vmatmul.msk.f32.gmra.mxu2 %vm85_vm1, %v1962_v4  ;;  %426 = vmatpush.msra.mxu3 %v2225_v59 }
  0x46   :  { %1607 = vmatmul.msk.f32.gmra.mxu3 %vm85_vm1, %v1962_v4  ;;  %406 = vmatpush.msra.mxu2 %v2237_v10  ;;  %v3100_v4 = vmov 0.0  }
  0x47   :  { %558 = vmatpush.msrb.mxu3 %v2029_v22  ;;  %501 = vmatpush.msra.mxu0 %v2035_v24 }
  0x48   :  { %538 = vmatpush.msrb.mxu2 %v2031_v23  ;;  %519 = vmatpush.msrb.mxu1 %v2023_v20 }
  0x49   :  { %559 = vmatpush.msrb.mxu3 %v2041_v26  ;;  %502 = vmatpush.msra.mxu0 %v2046_v28 }
  0x4a   :  { %539 = vmatpush.msrb.mxu2 %v2043_v27  ;;  %520 = vmatpush.msrb.mxu1 %v2037_v25 }
  0x4b   :  { %560 = vmatpush.msrb.mxu3 %v2053_v30  ;;  %503 = vmatpush.msra.mxu0 %v2064_v33 }
  0x4c   :  { %1590 = vmatmul.msk.f32.gmra.mxu1 %vm85_vm1, %v1967_v5  ;;  %540 = vmatpush.msrb.mxu2 %v2055_v31 }
  0x4d   :  { %1599 = vmatmul.msk.f32.gmra.mxu2 %vm85_vm1, %v1967_v5  ;;  %521 = vmatpush.msrb.mxu1 %v2048_v29 }
  0x4e   :  { %1608 = vmatmul.msk.f32.gmra.mxu3 %vm85_vm1, %v1967_v5  ;;  %541 = vmatpush.msrb.mxu2 %v2074_v36  ;;  %v3101_v5 = vld [vmem:[#allocation17_spill] sm:$0xff] }
  0x4f   :  { %561 = vmatpush.msrb.mxu3 %v2072_v35  ;;  %522 = vmatpush.msrb.mxu1 %v2067_v34 }
  0x50   :  { %542 = vmatpush.msrb.mxu2 %v2086_v40  ;;  %504 = vmatpush.msra.mxu0 %v2078_v37 }
  0x51   :  { %562 = vmatpush.msrb.mxu3 %v2084_v39  ;;  %523 = vmatpush.msrb.mxu1 %v2080_v38 }
  0x52   :  { %543 = vmatpush.msrb.mxu2 %v2098_v44  ;;  %505 = vmatpush.msra.mxu0 %v2088_v41 }
  0x53   :  { %563 = vmatpush.msrb.mxu3 %v2096_v43  ;;  %524 = vmatpush.msrb.mxu1 %v2091_v42 }
  0x54   :  { %1591 = vmatmul.msk.f32.gmra.mxu1 %vm85_vm1, %v1972_v6  ;;  %544 = vmatpush.msrb.mxu2 %v2117_v49 }
  0x55   :  { %1600 = vmatmul.msk.f32.gmra.mxu2 %vm85_vm1, %v1972_v6  ;;  %564 = vmatpush.msrb.mxu3 %v2115_v48 }
  0x56   :  { %1609 = vmatmul.msk.f32.gmra.mxu3 %vm85_vm1, %v1972_v6  ;;  %525 = vmatpush.msrb.mxu1 %v2110_v47  ;;  %v3102_v6 = vld [vmem:[#allocation21_spill] sm:$0xff] }
  0x57   :  { %545 = vmatpush.msrb.mxu2 %v2129_v53  ;;  %565 = vmatpush.msrb.mxu3 %v2127_v52 }
  0x58   :  { %506 = vmatpush.msra.mxu0 %v2107_v46  ;;  %526 = vmatpush.msrb.mxu1 %v2123_v51 }
  0x59   :  { %546 = vmatpush.msrb.mxu2 %v2141_v57  ;;  %566 = vmatpush.msrb.mxu3 %v2139_v56 }
  0x5a   :  { %507 = vmatpush.msra.mxu0 %v2121_v50  ;;  %527 = vmatpush.msrb.mxu1 %v2134_v55 }
  0x5b   :  { %547 = vmatpush.msrb.mxu2 %v2166_v0  ;;  %567 = vmatpush.msrb.mxu3 %v2160_v62 }
  0x5c   :  { %387 = vmatmul.f32.vlgmr.msra.gmra.mxu1 %v3100_v4  ;;  %508 = vmatpush.msra.mxu0 %v2131_v54 }
  0x5d   :  { %407 = vmatmul.f32.vlgmr.msra.gmra.mxu2 %v3100_v4  ;;  %528 = vmatpush.msrb.mxu1 %v2158_v61 }
  0x5e   :  { %427 = vmatmul.f32.vlgmr.msra.gmra.mxu3 %v3100_v4  ;;  %548 = vmatpush.msrb.mxu2 %v2178_v7  ;;  %v3103_v4 = vld [vmem:[#allocation8_spill] sm:$0xff] }
  0x5f   :  { %568 = vmatpush.msrb.mxu3 %v2172_v2  ;;  %509 = vmatpush.msra.mxu0 %v2143_v58 }
  0x60   :  { %529 = vmatpush.msrb.mxu1 %v2170_v1  ;;  %549 = vmatpush.msrb.mxu2 %v2200_v15 }
  0x61   :  { %569 = vmatpush.msrb.mxu3 %v2183_v9  ;;  %510 = vmatpush.msra.mxu0 %v2152_v60 }
  0x62   :  { %530 = vmatpush.msrb.mxu1 %v2181_v8  ;;  %550 = vmatpush.msrb.mxu2 %v2208_v19 }
  0x63   :  { %570 = vmatpush.msrb.mxu3 %v2198_v13  ;;  %511 = vmatpush.msra.mxu0 %v2164_v63 }
  0x64   :  { %531 = vmatpush.msrb.mxu1 %v2194_v12  ;;  %551 = vmatpush.msrb.mxu2 %v2217_v11 }
  0x65   :  { %571 = vmatpush.msrb.mxu3 %v2210_v32  ;;  %512 = vmatpush.msra.mxu0 %v3101_v5 }
  0x66   :  { %532 = vmatpush.msrb.mxu1 %v2204_v17  ;;  %552 = vmatpush.msrb.mxu2 %v2229_v3 }
  0x67   :  { %572 = vmatpush.msrb.mxu3 %v2219_v16  ;;  %513 = vmatpush.msra.mxu0 %v3102_v6 }
  0x68   :  { %533 = vmatpush.msrb.mxu1 %v2214_v45  ;;  %553 = vmatpush.msrb.mxu2 %v2237_v10 }
  0x69   :  { %573 = vmatpush.msrb.mxu3 %v2225_v59  ;;  %645 = vmatpush.msrb.mxu0 %v3103_v4 }
  0x6a   :  { %665 = vmatpush.msra.mxu1 %v2016_v18  ;;  %685 = vmatpush.msra.mxu2 %v2031_v23 }
  0x6b   :  { %705 = vmatpush.msra.mxu3 %v2029_v22  ;;  %646 = vmatpush.msrb.mxu0 %v2003_v14 }
  0x6c   :  { %666 = vmatpush.msra.mxu1 %v2023_v20  ;;  %686 = vmatpush.msra.mxu2 %v2043_v27 }
  0x6d   :  { %706 = vmatpush.msra.mxu3 %v2041_v26  ;;  %647 = vmatpush.msrb.mxu0 %v2025_v21 }
  0x6e   :  { %667 = vmatpush.msra.mxu1 %v2037_v25  ;;  %687 = vmatpush.msra.mxu2 %v2055_v31 }
  0x6f   :  { %707 = vmatpush.msra.mxu3 %v2053_v30  ;;  %648 = vmatpush.msrb.mxu0 %v2035_v24 }
  0x70   :  { %668 = vmatpush.msra.mxu1 %v2048_v29  ;;  %688 = vmatpush.msra.mxu2 %v2074_v36 }
  0x71   :  { %708 = vmatpush.msra.mxu3 %v2072_v35  ;;  %649 = vmatpush.msrb.mxu0 %v2046_v28 }
  0x72   :  { %669 = vmatpush.msra.mxu1 %v2067_v34  ;;  %689 = vmatpush.msra.mxu2 %v2086_v40 }
  0x73   :  { %709 = vmatpush.msra.mxu3 %v2084_v39  ;;  %650 = vmatpush.msrb.mxu0 %v2064_v33 }
  0x74   :  { %670 = vmatpush.msra.mxu1 %v2080_v38  ;;  %690 = vmatpush.msra.mxu2 %v2098_v44 }
  0x75   :  { %710 = vmatpush.msra.mxu3 %v2096_v43  ;;  %651 = vmatpush.msrb.mxu0 %v2078_v37 }
  0x76   :  { %671 = vmatpush.msra.mxu1 %v2091_v42  ;;  %691 = vmatpush.msra.mxu2 %v2117_v49 }
  0x77   :  { %711 = vmatpush.msra.mxu3 %v2115_v48  ;;  %652 = vmatpush.msrb.mxu0 %v2088_v41 }
  0x78   :  { %672 = vmatpush.msra.mxu1 %v2110_v47  ;;  %692 = vmatpush.msra.mxu2 %v2129_v53 }
  0x79   :  { %712 = vmatpush.msra.mxu3 %v2127_v52  ;;  %653 = vmatpush.msrb.mxu0 %v2107_v46 }
  0x7a   :  { %673 = vmatpush.msra.mxu1 %v2123_v51  ;;  %693 = vmatpush.msra.mxu2 %v2141_v57 }
  0x7b   :  { %713 = vmatpush.msra.mxu3 %v2139_v56  ;;  %654 = vmatpush.msrb.mxu0 %v2121_v50 }
  0x7c   :  { %674 = vmatpush.msra.mxu1 %v2134_v55  ;;  %694 = vmatpush.msra.mxu2 %v2166_v0 }
  0x7d   :  { %714 = vmatpush.msra.mxu3 %v2160_v62  ;;  %655 = vmatpush.msrb.mxu0 %v2131_v54 }
  0x7e   :  { %675 = vmatpush.msra.mxu1 %v2158_v61  ;;  %695 = vmatpush.msra.mxu2 %v2178_v7 }
  0x7f   :  { %715 = vmatpush.msra.mxu3 %v2172_v2  ;;  %656 = vmatpush.msrb.mxu0 %v2143_v58 }
  0x80   :  { %676 = vmatpush.msra.mxu1 %v2170_v1  ;;  %696 = vmatpush.msra.mxu2 %v2200_v15 }
  0x81   :  { %716 = vmatpush.msra.mxu3 %v2183_v9  ;;  %657 = vmatpush.msrb.mxu0 %v2152_v60 }
  0x82   :  { %677 = vmatpush.msra.mxu1 %v2181_v8  ;;  %697 = vmatpush.msra.mxu2 %v2208_v19 }
  0x83   :  { %717 = vmatpush.msra.mxu3 %v2198_v13  ;;  %658 = vmatpush.msrb.mxu0 %v2164_v63 }
  0x84   :  { %678 = vmatpush.msra.mxu1 %v2194_v12  ;;  %698 = vmatpush.msra.mxu2 %v2217_v11 }
  0x85   :  { %718 = vmatpush.msra.mxu3 %v2210_v32  ;;  %659 = vmatpush.msrb.mxu0 %v3101_v5  ;;  %v75_v32 = vld [vmem:[%s2972_s3] sm:$0xf] }
  0x86   :  { %679 = vmatpush.msra.mxu1 %v2204_v17  ;;  %699 = vmatpush.msra.mxu2 %v2229_v3  ;;  %v77_v11 = vperm.slane %v75_v32, 0 }
  0x87   :  { %719 = vmatpush.msra.mxu3 %v2219_v16  ;;  %660 = vmatpush.msrb.mxu0 %v3102_v6 }
  0x88   :  { %680 = vmatpush.msra.mxu1 %v2214_v45  ;;  %700 = vmatpush.msra.mxu2 %v2237_v10 }
  0x89   :  { %720 = vmatpush.msra.mxu3 %v2225_v59  ;;  %v78_v59 = vperm.slane %v75_v32, 1 }
  0x90   :  { %v140_v5 = vpop.f32.mrf.mxu0  ;;  %v155_v12 = vpop.f32.mrf.mxu1 }
  0x91   :  { %v2387_v17 = vadd.f32 %v155_v12, %v77_v11 }
  0x93   :  { %3104 = vst [vmem:[#allocation8_spill] sm:$0xff] %v2387_v17  ;;  %v2403_v17 = vperm.slane %v75_v32, 2 }
  0x97   :  { %v158_v3 = vpop.f32.mrf.mxu2  ;;  %v161_v63 = vpop.f32.mrf.mxu3 }
  0x98   :  { %v2389_v16 = vadd.f32 %v158_v3, %v77_v11  ;;  %v2391_v6 = vadd.f32 %v161_v63, %v77_v11  ;;  %v143_v45 = vpop.f32.mrf.mxu0  ;;  %v80_v3 = vperm.slane %v75_v32, 3 }
  0x99   :  { %v181_v13 = vpop.f32.mrf.mxu1  ;;  %v2393_v10 = vadd.f32 %v143_v45, %v77_v11 }
  0x9a   :  { %3105 = vst [vmem:[#allocation34_spill] sm:$0xff] %v2389_v16 }
  0x9b   :  { %3106 = vst [vmem:[#allocation35_spill] sm:$0xff] %v2391_v6 }
  0x9c   :  { %3107 = vst [vmem:[#allocation36_spill] sm:$0xff] %v2393_v10 }
  0x9f   :  { %v2395_v19 = vpop.f32.mrf.mxu2 }
  0xa0   :  { %v2397_v8 = vpop.f32.mrf.mxu3  ;;  %v146_v60 = vpop.f32.mrf.mxu0 }
  0xa1   :  { %v184_v9 = vpop.f32.mrf.mxu1  ;;  %v2399_v15 = vadd.f32 %v146_v60, %v77_v11 }
  0xa2   :  { %v2401_v12 = vadd.f32 %v184_v9, %v78_v59 }
  0xa3   :  { %3108 = vst [vmem:[#allocation37_spill] sm:$0xff] %v2399_v15 }
  0xa4   :  { %3109 = vst [vmem:[#allocation38_spill] sm:$0xff] %v2401_v12 }
  0xa7   :  { %v225_v63 = vpop.f32.mrf.mxu2 }
  0xa8   :  { %v266_v6 = vpop.f32.mrf.mxu3  ;;  %v2406_v16 = vadd.f32 %v225_v63, %v2403_v17  ;;  %v149_v10 = vpop.f32.mrf.mxu0 }
  0xa9   :  { %v2408_v45 = vadd.f32 %v266_v6, %v80_v3  ;;  %v187_v1 = vpop.f32.mrf.mxu1  ;;  %v2410_v58 = vadd.f32 %v149_v10, %v77_v11 }
  0xaa   :  { %3110 = vst [vmem:[#allocation39_spill] sm:$0xff] %v2406_v16  ;;  %v2412_v2 = vadd.f32 %v187_v1, %v78_v59 }
  0xab   :  { %3111 = vst [vmem:[#allocation40_spill] sm:$0xff] %v2408_v45 }
  0xac   :  { %3112 = vst [vmem:[#allocation41_spill] sm:$0xff] %v2410_v58 }
  0xad   :  { %3113 = vst [vmem:[#allocation42_spill] sm:$0xff] %v2412_v2 }
  0xaf   :  { %v228_v60 = vpop.f32.mrf.mxu2 }
  0xb0   :  { %v269_v15 = vpop.f32.mrf.mxu3  ;;  %v2415_v9 = vadd.f32 %v228_v60, %v2403_v17 }
  0xb1   :  { %v2417_v12 = vadd.f32 %v269_v15, %v80_v3  ;;  %v190_v32 = vpop.f32.mrf.mxu1  ;;  %v152_v7 = vpop.f32.mrf.mxu0 }
  0xb2   :  { %3114 = vst [vmem:[#allocation43_spill] sm:$0xff] %v2415_v9  ;;  %v2419_v61 = vadd.f32 %v190_v32, %v78_v59  ;;  %v2421_v63 = vadd.f32 %v152_v7, %v77_v11 }
  0xb3   :  { %3115 = vst [vmem:[#allocation44_spill] sm:$0xff] %v2417_v12 }
  0xb4   :  { %3116 = vst [vmem:[#allocation45_spill] sm:$0xff] %v2419_v61  ;;  %v141_v61 = vadd.f32 %v140_v5, %v77_v11 }
  0xb5   :  { %3117 = vst [vmem:[#allocation46_spill] sm:$0xff] %v2421_v63 }
  0xb8   :  { %v231_v6 = vpop.f32.mrf.mxu2  ;;  %v272_v10 = vpop.f32.mrf.mxu3 }
  0xb9   :  { %v2424_v16 = vadd.f32 %v231_v6, %v2403_v17  ;;  %v193_v1 = vpop.f32.mrf.mxu1  ;;  %v2426_v58 = vadd.f32 %v272_v10, %v80_v3 }
  0xba   :  { %v2428_v2 = vadd.f32 %v193_v1, %v78_v59  ;;  %v368_v63 = vpop.f32.mrf.mxu0 }
  0xbb   :  { %3118 = vst [vmem:[#allocation47_spill] sm:$0xff] %v2424_v16  ;;  %v431_v6 = vadd.f32 %v368_v63, %v141_v61  ;;  %v182_v63 = vadd.f32 %v181_v13, %v78_v59 }
  0xbc   :  { %3119 = vst [vmem:[#allocation48_spill] sm:$0xff] %v2426_v58 }
  0xbd   :  { %3120 = vst [vmem:[#allocation49_spill] sm:$0xff] %v2428_v2  ;;  %v1610_v2 = vmul.f32 -1.442695, %v431_v6 }
  0xbf   :  { %1651 = vpow2.f32 %v1610_v2 }
  0xc0   :  { %v234_v60 = vpop.f32.mrf.mxu2 }
  0xc1   :  { %v2431_v15 = vadd.f32 %v234_v60, %v2403_v17  ;;  %v275_v9 = vpop.f32.mrf.mxu3  ;;  %v196_v12 = vpop.f32.mrf.mxu1 }
  0xc2   :  { %v2433_v32 = vadd.f32 %v275_v9, %v80_v3  ;;  %v2435_v7 = vadd.f32 %v196_v12, %v78_v59 }
  0xc3   :  { %3121 = vst [vmem:[#allocation50_spill] sm:$0xff] %v2431_v15 }
  0xc4   :  { %3122 = vst [vmem:[#allocation51_spill] sm:$0xff] %v2433_v32 }
  0xc5   :  { %3123 = vst [vmem:[#allocation52_spill] sm:$0xff] %v2435_v7 }
  0xc8   :  { %v237_v16 = vpop.f32.mrf.mxu2 }
  0xc9   :  { %v2438_v45 = vadd.f32 %v237_v16, %v2403_v17  ;;  %v278_v10 = vpop.f32.mrf.mxu3  ;;  %v199_v1 = vpop.f32.mrf.mxu1 }
  0xca   :  { %v2440_v58 = vadd.f32 %v278_v10, %v80_v3  ;;  %v2442_v60 = vadd.f32 %v199_v1, %v78_v59  ;;  %v1652_v16 = vpop.eup %1651 }
  0xcb   :  { %3124 = vst [vmem:[#allocation53_spill] sm:$0xff] %v2438_v45  ;;  %v438_v5 = vadd.f32 1.0, %v1652_v16 }
  0xcc   :  { %3125 = vst [vmem:[#allocation54_spill] sm:$0xff] %v2440_v58 }
  0xcd   :  { %3126 = vst [vmem:[#allocation55_spill] sm:$0xff] %v2442_v60  ;;  %1653 = vrcp.f32 %v438_v5  ;;  %vm444_vm3 = vweird.f32 %v438_v5 }
  0xd0   :  { %v240_v15 = vpop.f32.mrf.mxu2 }
  0xd1   :  { %v2445_v9 = vadd.f32 %v240_v15, %v2403_v17  ;;  %v281_v12 = vpop.f32.mrf.mxu3  ;;  %v202_v7 = vpop.f32.mrf.mxu1 }
  0xd2   :  { %v2447_v11 = vadd.f32 %v281_v12, %v80_v3  ;;  %v2449_v61 = vadd.f32 %v202_v7, %v78_v59  ;;  %v264_v12 = vadd.f32 %v2397_v8, %v80_v3 }
  0xd3   :  { %3127 = vst [vmem:[#allocation56_spill] sm:$0xff] %v2445_v9  ;;  %v1654_v9 = vpop.eup %1653 }
  0xd4   :  { %3128 = vst [vmem:[#allocation57_spill] sm:$0xff] %v2447_v11  ;;  %v440_v16 = vmul.f32 %v1654_v9, %v438_v5  ;;  %vm445_vm2 = vweird.f32 %v1654_v9 }
  0xd5   :  { %3129 = vst [vmem:[#allocation58_spill] sm:$0xff] %v2449_v61  ;;  %vm446_vm5 = vmor %vm444_vm3, %vm445_vm2 }
  0xd8   :  { %v243_v45 = vpop.f32.mrf.mxu2 }
  0xd9   :  { %v2452_v6 = vadd.f32 %v243_v45, %v2403_v17  ;;  %v284_v10 = vpop.f32.mrf.mxu3  ;;  %v388_v1 = vpop.f32.mrf.mxu1 }
  0xda   :  { %v2454_v2 = vadd.f32 %v284_v10, %v80_v3  ;;  %v432_v60 = vadd.f32 %v388_v1, %v182_v63  ;;  %v223_v10 = vadd.f32 %v2395_v19, %v2403_v17 }
  0xdb   :  { %3130 = vst [vmem:[#allocation59_spill] sm:$0xff] %v2452_v6  ;;  %v441_v6 = vsub.f32 1.0, %v440_v16 }
  0xdc   :  { %3131 = vst [vmem:[#allocation60_spill] sm:$0xff] %v2454_v2  ;;  %v1611_v15 = vmul.f32 -1.442695, %v432_v60 }
  0xdd   :  { %v442_v60 = vmul.f32 %v1654_v9, %v441_v6 }
  0xde   :  { %1655 = vpow2.f32 %v1611_v15 }
  0xe0   :  { %v408_v45 = vpop.f32.mrf.mxu2 }
  0xe1   :  { %v428_v7 = vpop.f32.mrf.mxu3  ;;  %v433_v63 = vadd.f32 %v408_v45, %v223_v10 }
  0xe2   :  { %v434_v61 = vadd.f32 %v428_v7, %v264_v12  ;;  %v443_v12 = vadd.f32 %v1654_v9, %v442_v60 }
  0xe4   :  { %v1656_v11 = vpop.eup %1655  ;;  %v1612_v13 = vmul.f32 -1.442695, %v434_v61  ;;  %v447_v19 = vsel %vm446_vm5, %v1654_v9, %v443_v12 }
  0xe5   :  { %v457_v59 = vadd.f32 1.0, %v1656_v11  ;;  %v450_v11 = vand.u32 2147483648, %v438_v5 }
  0xe6   :  { %1657 = vpow2.f32 %v1612_v13  ;;  %v448_v13 = vand.u32 2147483647, %v438_v5 }
  0xe7   :  { %1659 = vrcp.f32 %v457_v59  ;;  %v469_v61 = vand.u32 2147483648, %v457_v59  ;;  %v467_v58 = vand.u32 2147483647, %v457_v59  ;;  %vm463_vm6 = vweird.f32 %v457_v59 }
  0xe8   :  { %1661 = vtanh.f32 %v433_v63  ;;  %v451_v10 = vor.u32 1.1754944e-38, %v450_v11  ;;  %vm449_vm8 = vcmp.eq.f32.partialorder %v448_v13, 8.507059e+37 }
  0xe9   :  { %v470_v45 = vor.u32 1.1754944e-38, %v469_v61  ;;  %vm468_vm9 = vcmp.eq.f32.partialorder %v467_v58, 8.507059e+37 }
  0xea   :  { %v452_v60 = vsel %vm449_vm8, %v451_v10, %v447_v19 }
  0xec   :  { %v1658_v1 = vpop.eup %1657 }
  0xed   :  { %v1660_v15 = vpop.eup %1659  ;;  %v477_v2 = vadd.f32 1.0, %v1658_v1 }
  0xee   :  { %v459_v8 = vmul.f32 %v1660_v15, %v457_v59  ;;  %vm464_vm4 = vweird.f32 %v1660_v15  ;;  %v1662_v17 = vpop.eup %1661 }
  0xef   :  { %1663 = vrcp.f32 %v477_v2  ;;  %vm465_vm7 = vmor %vm463_vm6, %vm464_vm4  ;;  %v489_v59 = vand.u32 2147483648, %v477_v2  ;;  %vm483_vm11 = vweird.f32 %v477_v2  ;;  %v487_v12 = vand.u32 2147483647, %v477_v2 }
  0xf0   :  { %v460_v3 = vsub.f32 1.0, %v459_v8 }
  0xf1   :  { %vm488_vm13 = vcmp.eq.f32.partialorder %v487_v12, 8.507059e+37 }
  0xf2   :  { %v461_v7 = vmul.f32 %v1660_v15, %v460_v3  ;;  %v494_v3 = vmul.f32 %v1662_v17, %v452_v60 }
  0xf4   :  { %v462_v6 = vadd.f32 %v1660_v15, %v461_v7 }
  0xf5   :  { %v1664_v16 = vpop.eup %1663 }
  0xf6   :  { %v466_v63 = vsel %vm465_vm7, %v1660_v15, %v462_v6  ;;  %v479_v1 = vmul.f32 %v1664_v16, %v477_v2  ;;  %vm484_vm10 = vweird.f32 %v1664_v16  ;;  %v490_v15 = vor.u32 1.1754944e-38, %v489_v59  ;;  %v3160_v6 = vld [vmem:[#allocation39_spill] sm:$0xff] }
  0xf7   :  { %v471_v8 = vsel %vm468_vm9, %v470_v45, %v466_v63  ;;  %vm485_vm12 = vmor %vm483_vm11, %vm484_vm10 }
  0xf8   :  { %v493_v32 = vmul.f32 0.0, %v471_v8  ;;  %v480_v5 = vsub.f32 1.0, %v479_v1 }
  0xfa   :  { %v2459_v54 = vadd.f32 %v494_v3, %v493_v32  ;;  %v481_v62 = vmul.f32 %v1664_v16, %v480_v5 }
  0xfc   :  { %1665 = vtanh.f32 %v2459_v54  ;;  %v482_v9 = vadd.f32 %v1664_v16, %v481_v62 }
  0xfe   :  { %v486_v61 = vsel %vm485_vm12, %v1664_v16, %v482_v9 }
  0xff   :  { %v491_v11 = vsel %vm488_vm13, %v490_v15, %v486_v61 }
 0x102   :  { %v1666_v58 = vpop.eup %1665 }
 0x103   :  { %v497_v7 = vmul.f32 %v1666_v58, %v491_v11 }
 0x105   :  { %514 = vmatmul.f32.vlgmr.msra.gmra.mxu0 %v497_v7  ;;  %534 = vmatmul.f32.vlgmr.msrb.gmra.mxu1 %v497_v7 }
 0x106   :  { %554 = vmatmul.f32.vlgmr.msrb.gmra.mxu2 %v497_v7  ;;  %574 = vmatmul.f32.vlgmr.msrb.gmra.mxu3 %v497_v7 }
 0x107   :  { %792 = vmatpush.msra.mxu0 %v3103_v4  ;;  %812 = vmatpush.msrb.mxu1 %v2016_v18  ;;  %v3133_v18 = vld [vmem:[#allocation9_spill] sm:$0xff] }
 0x108   :  { %832 = vmatpush.msrb.mxu2 %v2031_v23  ;;  %852 = vmatpush.msrb.mxu3 %v2029_v22  ;;  %v3136_v22 = vld [vmem:[#allocation16_spill] sm:$0xff]  ;;  %v3137_v23 = vld [vmem:[#allocation10_spill] sm:$0xff] }
 0x109   :  { %793 = vmatpush.msra.mxu0 %v2003_v14  ;;  %813 = vmatpush.msrb.mxu1 %v2023_v20  ;;  %v3132_v14 = vld [vmem:[#allocation13_spill] sm:$0xff]  ;;  %v3134_v20 = vld [vmem:[#allocation12_spill] sm:$0xff] }
 0x10a   :  { %833 = vmatpush.msrb.mxu2 %v2043_v27  ;;  %853 = vmatpush.msrb.mxu3 %v2041_v26  ;;  %v3140_v26 = vld [vmem:[#allocation20_spill] sm:$0xff]  ;;  %v3141_v27 = vld [vmem:[#allocation11_spill] sm:$0xff] }
 0x10b   :  { %794 = vmatpush.msra.mxu0 %v2025_v21  ;;  %814 = vmatpush.msrb.mxu1 %v2037_v25  ;;  %v3135_v21 = vld [vmem:[#allocation18_spill] sm:$0xff]  ;;  %v3139_v25 = vld [vmem:[#allocation24_spill] sm:$0xff] }
 0x10c   :  { %834 = vmatpush.msrb.mxu2 %v2055_v31  ;;  %854 = vmatpush.msrb.mxu3 %v2053_v30  ;;  %v3144_v30 = vld [vmem:[#allocation23_spill] sm:$0xff]  ;;  %v3145_v31 = vld [vmem:[#allocation14_spill] sm:$0xff] }
 0x10d   :  { %795 = vmatpush.msra.mxu0 %v2035_v24  ;;  %815 = vmatpush.msrb.mxu1 %v2048_v29  ;;  %v3138_v24 = vld [vmem:[#allocation15_spill] sm:$0xff]  ;;  %v3143_v29 = vld [vmem:[#allocation26_spill] sm:$0xff] }
 0x10e   :  { %835 = vmatpush.msrb.mxu2 %v2074_v36  ;;  %855 = vmatpush.msrb.mxu3 %v2072_v35  ;;  %v3148_v35 = vld [vmem:[#allocation27_spill] sm:$0xff]  ;;  %v3149_v36 = vld [vmem:[#allocation17_spill] sm:$0xff] }
 0x10f   :  { %796 = vmatpush.msra.mxu0 %v2046_v28  ;;  %816 = vmatpush.msrb.mxu1 %v2067_v34  ;;  %v3142_v28 = vld [vmem:[#allocation19_spill] sm:$0xff]  ;;  %v3147_v34 = vld [vmem:[#allocation29_spill] sm:$0xff] }
 0x110   :  { %836 = vmatpush.msrb.mxu2 %v2086_v40  ;;  %856 = vmatpush.msrb.mxu3 %v2084_v39  ;;  %v3152_v39 = vld [vmem:[#allocation30_spill] sm:$0xff]  ;;  %v3153_v40 = vld [vmem:[#allocation21_spill] sm:$0xff] }
 0x111   :  { %797 = vmatpush.msra.mxu0 %v2064_v33  ;;  %817 = vmatpush.msrb.mxu1 %v2080_v38  ;;  %v3146_v33 = vld [vmem:[#allocation22_spill] sm:$0xff]  ;;  %v3151_v38 = vld [vmem:[#allocation32_spill] sm:$0xff] }
 0x112   :  { %837 = vmatpush.msrb.mxu2 %v2098_v44  ;;  %857 = vmatpush.msrb.mxu3 %v2096_v43  ;;  %v3156_v43 = vld [vmem:[#allocation31_spill] sm:$0xff] }
 0x113   :  { %798 = vmatpush.msra.mxu0 %v2078_v37  ;;  %818 = vmatpush.msrb.mxu1 %v2091_v42  ;;  %v3150_v37 = vld [vmem:[#allocation25_spill] sm:$0xff] }
 0x114   :  { %838 = vmatpush.msrb.mxu2 %v2117_v49  ;;  %858 = vmatpush.msrb.mxu3 %v2115_v48  ;;  %v3155_v42 = vld [vmem:[#allocation33_spill] sm:$0xff]  ;;  %v3158_v49 = vld [vmem:[#allocation38_spill] sm:$0xff] }
 0x115   :  { %799 = vmatpush.msra.mxu0 %v2088_v41  ;;  %819 = vmatpush.msrb.mxu1 %v2110_v47  ;;  %v3154_v41 = vld [vmem:[#allocation28_spill] sm:$0xff] }
 0x116   :  { %839 = vmatpush.msrb.mxu2 %v2129_v53  ;;  %859 = vmatpush.msrb.mxu3 %v2127_v52  ;;  %v3157_v47 = vld [vmem:[#allocation36_spill] sm:$0xff] }
 0x117   :  { %800 = vmatpush.msra.mxu0 %v2107_v46  ;;  %820 = vmatpush.msrb.mxu1 %v2123_v51 }
 0x118   :  { %840 = vmatpush.msrb.mxu2 %v2141_v57  ;;  %860 = vmatpush.msrb.mxu3 %v2139_v56 }
 0x119   :  { %801 = vmatpush.msra.mxu0 %v2121_v50  ;;  %821 = vmatpush.msrb.mxu1 %v2134_v55  ;;  %v3159_v55 = vld [vmem:[#allocation40_spill] sm:$0xff] }
 0x11a   :  { %841 = vmatpush.msrb.mxu2 %v2166_v0  ;;  %861 = vmatpush.msrb.mxu3 %v3132_v14 }
 0x11b   :  { %802 = vmatpush.msra.mxu0 %v3133_v18  ;;  %822 = vmatpush.msrb.mxu1 %v3134_v20 }
 0x11c   :  { %842 = vmatpush.msrb.mxu2 %v3135_v21  ;;  %862 = vmatpush.msrb.mxu3 %v3136_v22 }
 0x11d   :  { %803 = vmatpush.msra.mxu0 %v3137_v23  ;;  %823 = vmatpush.msrb.mxu1 %v3138_v24 }
 0x11e   :  { %843 = vmatpush.msrb.mxu2 %v3139_v25  ;;  %863 = vmatpush.msrb.mxu3 %v3140_v26 }
 0x11f   :  { %804 = vmatpush.msra.mxu0 %v3141_v27  ;;  %824 = vmatpush.msrb.mxu1 %v3142_v28 }
 0x120   :  { %844 = vmatpush.msrb.mxu2 %v3143_v29  ;;  %864 = vmatpush.msrb.mxu3 %v3144_v30 }
 0x121   :  { %805 = vmatpush.msra.mxu0 %v3145_v31  ;;  %825 = vmatpush.msrb.mxu1 %v3146_v33 }
 0x122   :  { %845 = vmatpush.msrb.mxu2 %v3147_v34  ;;  %865 = vmatpush.msrb.mxu3 %v3148_v35 }
 0x123   :  { %806 = vmatpush.msra.mxu0 %v3149_v36  ;;  %826 = vmatpush.msrb.mxu1 %v3150_v37 }
 0x124   :  { %846 = vmatpush.msrb.mxu2 %v3151_v38  ;;  %866 = vmatpush.msrb.mxu3 %v3152_v39 }
 0x125   :  { %807 = vmatpush.msra.mxu0 %v3153_v40  ;;  %827 = vmatpush.msrb.mxu1 %v3154_v41 }
 0x126   :  { %847 = vmatpush.msrb.mxu2 %v3155_v42  ;;  %867 = vmatpush.msrb.mxu3 %v3156_v43 }
 0x182   :  { %v515_v44 = vpop.f32.mrf.mxu0  ;;  %v535_v46 = vpop.f32.mrf.mxu1 }
 0x183   :  { %v578_v48 = vadd.f32 %v515_v44, %v3157_v47  ;;  %v579_v50 = vadd.f32 %v535_v46, %v3158_v49 }
 0x185   :  { %v1613_v51 = vmul.f32 -1.442695, %v578_v48  ;;  %v1614_v52 = vmul.f32 -1.442695, %v579_v50 }
 0x187   :  { %1667 = vpow2.f32 %v1613_v51 }
 0x188   :  { %1669 = vpow2.f32 %v1614_v52  ;;  %v2537_v52 = vld [vmem:[#allocation2 + $0x1e8] sm:$0xff] }
 0x189   :  { %v575_v53 = vpop.f32.mrf.mxu3  ;;  %v555_v2 = vpop.f32.mrf.mxu2 }
 0x18a   :  { %v581_v56 = vadd.f32 %v575_v53, %v3159_v55  ;;  %v580_v16 = vadd.f32 %v555_v2, %v3160_v6  ;;  %v2540_v53 = vld [vmem:[#allocation2 + $0x1f0] sm:$0xff]  ;;  %v2543_v55 = vld [vmem:[#allocation2 + $0x1f8] sm:$0xff] }
 0x18b   :  { %v2564_v2 = vld [vmem:[#allocation2 + $0x1b0] sm:$0xff] }
 0x18c   :  { %v1615_v57 = vmul.f32 -1.442695, %v581_v56  ;;  %v2546_v56 = vld [vmem:[#allocation2 + $0x1c0] sm:$0xff]  ;;  %v2576_v6 = vld [vmem:[#allocation2 + $0x190] sm:$0xff] }
 0x18d   :  { %v1668_v62 = vpop.eup %1667 }
 0x18e   :  { %v1670_v0 = vpop.eup %1669  ;;  %v585_v4 = vadd.f32 1.0, %v1668_v62  ;;  %1671 = vpow2.f32 %v1615_v57  ;;  %v2549_v57 = vld [vmem:[#allocation2 + $0x1c8] sm:$0xff]  ;;  %v2552_v62 = vld [vmem:[#allocation2 + $0x1d0] sm:$0xff] }
 0x18f   :  { %v604_v32 = vadd.f32 1.0, %v1670_v0  ;;  %v2555_v0 = vld [vmem:[#allocation2 + $0x1d8] sm:$0xff] }
 0x190   :  { %1673 = vrcp.f32 %v585_v4  ;;  %v597_v8 = vand.u32 2147483648, %v585_v4  ;;  %v595_v9 = vand.u32 2147483647, %v585_v4  ;;  %vm591_vm0 = vweird.f32 %v585_v4 }
 0x191   :  { %1675 = vrcp.f32 %v604_v32  ;;  %v616_v3 = vand.u32 2147483648, %v604_v32  ;;  %v614_v12 = vand.u32 2147483647, %v604_v32  ;;  %vm610_vm1 = vweird.f32 %v604_v32 }
 0x192   :  { %v598_v58 = vor.u32 1.1754944e-38, %v597_v8  ;;  %vm596_vm4 = vcmp.eq.f32.partialorder %v595_v9, 8.507059e+37  ;;  %v2597_v8 = vld [vmem:[#allocation2 + $0x148] sm:$0xff]  ;;  %v2606_v9 = vld [vmem:[#allocation2 + $0x120] sm:$0xff] }
 0x193   :  { %v617_v14 = vor.u32 1.1754944e-38, %v616_v3  ;;  %vm615_vm5 = vcmp.eq.f32.partialorder %v614_v12, 8.507059e+37  ;;  %v2600_v3 = vld [vmem:[#allocation2 + $0x150] sm:$0xff] }
 0x194   :  { %v1672_v13 = vpop.eup %1671  ;;  %v2612_v12 = vld [vmem:[#allocation2 + $0x130] sm:$0xff] }
 0x195   :  { %v624_v17 = vadd.f32 1.0, %v1672_v13  ;;  %v2567_v13 = vld [vmem:[#allocation2 + $0x1b8] sm:$0xff] }
 0x196   :  { %v1674_v19 = vpop.eup %1673 }
 0x197   :  { %v1676_v45 = vpop.eup %1675  ;;  %v587_v10 = vmul.f32 %v1674_v19, %v585_v4  ;;  %1677 = vrcp.f32 %v624_v17  ;;  %vm592_vm14 = vweird.f32 %v1674_v19  ;;  %v636_v44 = vand.u32 2147483648, %v624_v17  ;;  %v2558_v4 = vld [vmem:[#allocation2 + $0x1a0] sm:$0xff] }
 0x198   :  { %v606_v63 = vmul.f32 %v1676_v45, %v604_v32  ;;  %1679 = vtanh.f32 %v580_v16  ;;  %vm611_vm15 = vweird.f32 %v1676_v45  ;;  %vm593_vm2 = vmor %vm591_vm0, %vm592_vm14  ;;  %vm630_vm7 = vweird.f32 %v624_v17  ;;  %v2561_v32 = vld [vmem:[#allocation2 + $0x1a8] sm:$0xff]  ;;  %v2579_v16 = vld [vmem:[#allocation2 + $0x198] sm:$0xff] }
 0x199   :  { %v588_v1 = vsub.f32 1.0, %v587_v10  ;;  %vm612_vm3 = vmor %vm610_vm1, %vm611_vm15  ;;  %v634_v46 = vand.u32 2147483647, %v624_v17  ;;  %v637_v48 = vor.u32 1.1754944e-38, %v636_v44  ;;  %v2585_v10 = vld [vmem:[#allocation2 + $0x168] sm:$0xff]  ;;  %v2664_v44 = vld [vmem:[#allocation2 + $0x80] sm:$0xff] }
 0x19a   :  { %v607_v60 = vsub.f32 1.0, %v606_v63  ;;  %v2588_v63 = vld [vmem:[#allocation2 + $0x170] sm:$0xff]  ;;  %3166 = vst [vmem:[#allocation10_spill] sm:$0xff] %v2664_v44 }
 0x19b   :  { %v589_v5 = vmul.f32 %v1674_v19, %v588_v1  ;;  %vm635_vm9 = vcmp.eq.f32.partialorder %v634_v46, 8.507059e+37  ;;  %v2591_v1 = vld [vmem:[#allocation2 + $0x178] sm:$0xff]  ;;  %v2667_v46 = vld [vmem:[#allocation2 + $0x88] sm:$0xff] }
 0x19c   :  { %v608_v59 = vmul.f32 %v1676_v45, %v607_v60  ;;  %v2594_v60 = vld [vmem:[#allocation2 + $0x140] sm:$0xff]  ;;  %3167 = vst [vmem:[#allocation15_spill] sm:$0xff] %v2667_v46 }
 0x19d   :  { %v1678_v61 = vpop.eup %1677  ;;  %v590_v15 = vadd.f32 %v1674_v19, %v589_v5  ;;  %v2603_v5 = vld [vmem:[#allocation2 + $0x158] sm:$0xff] }
 0x19e   :  { %v609_v11 = vadd.f32 %v1676_v45, %v608_v59  ;;  %v626_v7 = vmul.f32 %v1678_v61, %v624_v17  ;;  %v1680_v20 = vpop.eup %1679  ;;  %vm631_vm6 = vweird.f32 %v1678_v61  ;;  %v2570_v17 = vld [vmem:[#allocation2 + $0x180] sm:$0xff]  ;;  %v2609_v59 = vld [vmem:[#allocation2 + $0x128] sm:$0xff] }
 0x19f   :  { %v594_v18 = vsel %vm593_vm2, %v1674_v19, %v590_v15  ;;  %vm632_vm8 = vmor %vm630_vm7, %vm631_vm6  ;;  %v2573_v19 = vld [vmem:[#allocation2 + $0x188] sm:$0xff]  ;;  %v2618_v15 = vld [vmem:[#allocation2 + $0x100] sm:$0xff] }
 0x1a0   :  { %v599_v22 = vsel %vm596_vm4, %v598_v58, %v594_v18  ;;  %v613_v23 = vsel %vm612_vm3, %v1676_v45, %v609_v11  ;;  %v627_v24 = vsub.f32 1.0, %v626_v7  ;;  %v2582_v45 = vld [vmem:[#allocation2 + $0x160] sm:$0xff]  ;;  %v2621_v58 = vld [vmem:[#allocation2 + $0x108] sm:$0xff]  ;;  %v2624_v11 = vld [vmem:[#allocation2 + $0x110] sm:$0xff] }
 0x1a1   :  { %v618_v26 = vsel %vm615_vm5, %v617_v14, %v613_v23  ;;  %v641_v27 = vmul.f32 %v1680_v20, %v599_v22  ;;  %v2627_v7 = vld [vmem:[#allocation2 + $0x118] sm:$0xff]  ;;  %v2630_v14 = vld [vmem:[#allocation2 + $0xe0] sm:$0xff]  ;;  %v2633_v18 = vld [vmem:[#allocation2 + $0xe8] sm:$0xff] }
 0x1a2   :  { %v640_v28 = vmul.f32 %v618_v26, %v2459_v54  ;;  %v628_v31 = vmul.f32 %v1678_v61, %v627_v24  ;;  %v2534_v54 = vld [vmem:[#allocation2 + $0x1e0] sm:$0xff]  ;;  %v2636_v20 = vld [vmem:[#allocation2 + $0xf0] sm:$0xff]  ;;  %v2639_v22 = vld [vmem:[#allocation2 + $0xf8] sm:$0xff] }
 0x1a3   :  { %v2642_v23 = vld [vmem:[#allocation2 + $0xc0] sm:$0xff]  ;;  %v2645_v24 = vld [vmem:[#allocation2 + $0xc8] sm:$0xff]  ;;  %v2648_v26 = vld [vmem:[#allocation2 + $0xd0] sm:$0xff] }
 0x1a4   :  { %v2531_v36 = vadd.f32 %v641_v27, %v640_v28  ;;  %v629_v40 = vadd.f32 %v1678_v61, %v628_v31  ;;  %3161 = vst [vmem:[#allocation13_spill] sm:$0xff] %v2648_v26  ;;  %v2651_v27 = vld [vmem:[#allocation2 + $0xd8] sm:$0xff]  ;;  %v2654_v28 = vld [vmem:[#allocation2 + $0xa0] sm:$0xff]  ;;  %v2657_v31 = vld [vmem:[#allocation2 + $0xa8] sm:$0xff] }
 0x1a5   :  { %3162 = vst [vmem:[#allocation9_spill] sm:$0xff] %v2651_v27 }
 0x1a6   :  { %1681 = vtanh.f32 %v2531_v36  ;;  %v633_v47 = vsel %vm632_vm8, %v1678_v61, %v629_v40  ;;  %v2615_v61 = vld [vmem:[#allocation2 + $0x138] sm:$0xff]  ;;  %3163 = vst [vmem:[#allocation12_spill] sm:$0xff] %v2654_v28 }
 0x1a7   :  { %v638_v50 = vsel %vm635_vm9, %v637_v48, %v633_v47  ;;  %3164 = vst [vmem:[#allocation18_spill] sm:$0xff] %v2657_v31  ;;  %v2661_v40 = vld [vmem:[#allocation2 + $0xb8] sm:$0xff]  ;;  %v2674_v48 = vld [vmem:[#allocation2 + $0x60] sm:$0xff] }
 0x1a8   :  { %3165 = vst [vmem:[#allocation16_spill] sm:$0xff] %v2661_v40  ;;  %v2671_v47 = vld [vmem:[#allocation2 + $0x98] sm:$0xff] }
 0x1a9   :  { %3168 = vst [vmem:[#allocation24_spill] sm:$0xff] %v2671_v47 }
 0x1aa   :  { %3169 = vst [vmem:[#allocation20_spill] sm:$0xff] %v2674_v48 }
 0x1ac   :  { %v1682_v49 = vpop.eup %1681 }
 0x1ad   :  { %v644_v51 = vmul.f32 %v1682_v49, %v638_v50  ;;  %v2682_v49 = vld [vmem:[#allocation2 + $0x40] sm:$0xff]  ;;  %v3175_v50 = vld [vmem:[#allocation42_spill] sm:$0xff] }
 0x1ae   :  { %3171 = vst [vmem:[#allocation19_spill] sm:$0xff] %v2682_v49 }
 0x1af   :  { %661 = vmatmul.f32.vlgmr.msrb.gmra.mxu0 %v644_v51  ;;  %681 = vmatmul.f32.vlgmr.msra.gmra.mxu1 %v644_v51 }
 0x1b0   :  { %701 = vmatmul.f32.vlgmr.msra.gmra.mxu2 %v644_v51  ;;  %721 = vmatmul.f32.vlgmr.msra.gmra.mxu3 %v644_v51 }
 0x1b1   :  { %939 = vmatpush.msrb.mxu0 %v2534_v54  ;;  %959 = vmatpush.msra.mxu1 %v2537_v52 }
 0x1b2   :  { %979 = vmatpush.msra.mxu2 %v2540_v53  ;;  %999 = vmatpush.msra.mxu3 %v2543_v55 }
 0x1b3   :  { %940 = vmatpush.msrb.mxu0 %v2546_v56  ;;  %960 = vmatpush.msra.mxu1 %v2549_v57 }
 0x1b4   :  { %980 = vmatpush.msra.mxu2 %v2552_v62  ;;  %1000 = vmatpush.msra.mxu3 %v2555_v0 }
 0x1b5   :  { %941 = vmatpush.msrb.mxu0 %v2558_v4  ;;  %961 = vmatpush.msra.mxu1 %v2561_v32 }
 0x1b6   :  { %981 = vmatpush.msra.mxu2 %v2564_v2  ;;  %1001 = vmatpush.msra.mxu3 %v2567_v13 }
 0x1b7   :  { %942 = vmatpush.msrb.mxu0 %v2570_v17  ;;  %962 = vmatpush.msra.mxu1 %v2573_v19 }
 0x1b8   :  { %982 = vmatpush.msra.mxu2 %v2576_v6  ;;  %1002 = vmatpush.msra.mxu3 %v2579_v16 }
 0x1b9   :  { %943 = vmatpush.msrb.mxu0 %v2582_v45  ;;  %963 = vmatpush.msra.mxu1 %v2585_v10 }
 0x1ba   :  { %983 = vmatpush.msra.mxu2 %v2588_v63  ;;  %1003 = vmatpush.msra.mxu3 %v2591_v1 }
 0x1bb   :  { %944 = vmatpush.msrb.mxu0 %v2594_v60  ;;  %964 = vmatpush.msra.mxu1 %v2597_v8 }
 0x1bc   :  { %984 = vmatpush.msra.mxu2 %v2600_v3  ;;  %1004 = vmatpush.msra.mxu3 %v2603_v5 }
 0x1bd   :  { %945 = vmatpush.msrb.mxu0 %v2606_v9  ;;  %965 = vmatpush.msra.mxu1 %v2609_v59 }
 0x1be   :  { %985 = vmatpush.msra.mxu2 %v2612_v12  ;;  %1005 = vmatpush.msra.mxu3 %v2615_v61 }
 0x1bf   :  { %946 = vmatpush.msrb.mxu0 %v2618_v15  ;;  %966 = vmatpush.msra.mxu1 %v2621_v58 }
 0x1c0   :  { %986 = vmatpush.msra.mxu2 %v2624_v11  ;;  %1006 = vmatpush.msra.mxu3 %v2627_v7 }
 0x1c1   :  { %947 = vmatpush.msrb.mxu0 %v2630_v14  ;;  %967 = vmatpush.msra.mxu1 %v2633_v18 }
 0x1c2   :  { %987 = vmatpush.msra.mxu2 %v2636_v20  ;;  %1007 = vmatpush.msra.mxu3 %v2639_v22 }
 0x1c3   :  { %948 = vmatpush.msrb.mxu0 %v2642_v23  ;;  %968 = vmatpush.msra.mxu1 %v2645_v24 }
 0x1c4   :  { %988 = vmatpush.msra.mxu2 %v2648_v26  ;;  %1008 = vmatpush.msra.mxu3 %v2651_v27 }
 0x1c5   :  { %949 = vmatpush.msrb.mxu0 %v2654_v28  ;;  %969 = vmatpush.msra.mxu1 %v2657_v31 }
 0x1c6   :  { %989 = vmatpush.msra.mxu2 %v3135_v21  ;;  %1009 = vmatpush.msra.mxu3 %v2661_v40  ;;  %v2677_v21 = vld [vmem:[#allocation2 + $0x68] sm:$0xff] }
 0x1c7   :  { %950 = vmatpush.msrb.mxu0 %v2664_v44  ;;  %970 = vmatpush.msra.mxu1 %v2667_v46  ;;  %3170 = vst [vmem:[#allocation11_spill] sm:$0xff] %v2677_v21 }
 0x1c8   :  { %990 = vmatpush.msra.mxu2 %v3139_v25  ;;  %1010 = vmatpush.msra.mxu3 %v2671_v47  ;;  %v2688_v25 = vld [vmem:[#allocation2 + $0x20] sm:$0xff] }
 0x1c9   :  { %951 = vmatpush.msrb.mxu0 %v2674_v48  ;;  %971 = vmatpush.msra.mxu1 %v2677_v21  ;;  %3172 = vst [vmem:[#allocation26_spill] sm:$0xff] %v2688_v25 }
 0x1ca   :  { %991 = vmatpush.msra.mxu2 %v3143_v29  ;;  %1011 = vmatpush.msra.mxu3 %v3144_v30  ;;  %v2694_v29 = vld [vmem:[#allocation2] sm:$0xff] }
 0x1cb   :  { %952 = vmatpush.msrb.mxu0 %v2682_v49  ;;  %972 = vmatpush.msra.mxu1 %v3146_v33  ;;  %3173 = vst [vmem:[#allocation23_spill] sm:$0xff] %v2694_v29 }
 0x1cc   :  { %992 = vmatpush.msra.mxu2 %v3147_v34  ;;  %1012 = vmatpush.msra.mxu3 %v3148_v35  ;;  %v3174_v34 = vld [vmem:[#allocation37_spill] sm:$0xff] }
 0x1cd   :  { %953 = vmatpush.msrb.mxu0 %v2688_v25  ;;  %973 = vmatpush.msra.mxu1 %v3150_v37  ;;  %v3176_v25 = vld [vmem:[#allocation44_spill] sm:$0xff] }
 0x1ce   :  { %993 = vmatpush.msra.mxu2 %v3151_v38  ;;  %1013 = vmatpush.msra.mxu3 %v3152_v39 }
 0x1cf   :  { %954 = vmatpush.msrb.mxu0 %v2694_v29  ;;  %974 = vmatpush.msra.mxu1 %v3154_v41 }
 0x1d0   :  { %994 = vmatpush.msra.mxu2 %v3155_v42  ;;  %1014 = vmatpush.msra.mxu3 %v3156_v43 }
 0x22c   :  { %v662_v30 = vpop.f32.mrf.mxu0  ;;  %v682_v33 = vpop.f32.mrf.mxu1 }
 0x22d   :  { %v725_v35 = vadd.f32 %v662_v30, %v3174_v34  ;;  %v726_v37 = vadd.f32 %v682_v33, %v3175_v50  ;;  %v3177_v33 = vld [vmem:[#allocation43_spill] sm:$0xff] }
 0x22f   :  { %v1616_v51 = vmul.f32 -1.442695, %v725_v35  ;;  %v1617_v38 = vmul.f32 -1.442695, %v726_v37 }
 0x231   :  { %1683 = vpow2.f32 %v1616_v51 }
 0x232   :  { %1685 = vpow2.f32 %v1617_v38 }
 0x233   :  { %v722_v39 = vpop.f32.mrf.mxu3  ;;  %v702_v43 = vpop.f32.mrf.mxu2 }
 0x234   :  { %v728_v49 = vadd.f32 %v722_v39, %v3176_v25  ;;  %v727_v35 = vadd.f32 %v702_v43, %v3177_v33 }
 0x236   :  { %v1618_v29 = vmul.f32 -1.442695, %v728_v49 }
 0x237   :  { %v1684_v21 = vpop.eup %1683 }
 0x238   :  { %v1686_v41 = vpop.eup %1685  ;;  %v732_v48 = vadd.f32 1.0, %v1684_v21  ;;  %1687 = vpow2.f32 %v1618_v29 }
 0x239   :  { %v751_v42 = vadd.f32 1.0, %v1686_v41 }
 0x23a   :  { %1689 = vrcp.f32 %v732_v48  ;;  %v744_v49 = vand.u32 2147483648, %v732_v48  ;;  %v742_v29 = vand.u32 2147483647, %v732_v48  ;;  %vm738_vm12 = vweird.f32 %v732_v48 }
 0x23b   :  { %1691 = vrcp.f32 %v751_v42  ;;  %v763_v39 = vand.u32 2147483648, %v751_v42  ;;  %v761_v46 = vand.u32 2147483647, %v751_v42  ;;  %vm757_vm13 = vweird.f32 %v751_v42 }
 0x23c   :  { %v745_v43 = vor.u32 1.1754944e-38, %v744_v49  ;;  %vm743_vm0 = vcmp.eq.f32.partialorder %v742_v29, 8.507059e+37 }
 0x23d   :  { %vm762_vm1 = vcmp.eq.f32.partialorder %v761_v46, 8.507059e+37 }
 0x23e   :  { %v1688_v47 = vpop.eup %1687 }
 0x23f   :  { %v771_v30 = vadd.f32 1.0, %v1688_v47 }
 0x240   :  { %v1690_v34 = vpop.eup %1689 }
 0x241   :  { %v1692_v50 = vpop.eup %1691  ;;  %v734_v37 = vmul.f32 %v1690_v34, %v732_v48  ;;  %1693 = vrcp.f32 %v771_v30  ;;  %vm739_vm10 = vweird.f32 %v1690_v34  ;;  %v783_v49 = vand.u32 2147483648, %v771_v30 }
 0x242   :  { %v753_v51 = vmul.f32 %v1692_v50, %v751_v42  ;;  %1695 = vtanh.f32 %v727_v35  ;;  %vm758_vm11 = vweird.f32 %v1692_v50  ;;  %vm740_vm14 = vmor %vm738_vm12, %vm739_vm10  ;;  %vm777_vm3 = vweird.f32 %v771_v30 }
 0x243   :  { %v735_v38 = vsub.f32 1.0, %v734_v37  ;;  %vm759_vm15 = vmor %vm757_vm13, %vm758_vm11  ;;  %v764_v37 = vor.u32 1.1754944e-38, %v763_v39  ;;  %v784_v29 = vor.u32 1.1754944e-38, %v783_v49  ;;  %v3196_v49 = vld [vmem:[#allocation26_spill] sm:$0xff] }
 0x244   :  { %v754_v25 = vsub.f32 1.0, %v753_v51 }
 0x245   :  { %v736_v21 = vmul.f32 %v1690_v34, %v735_v38 }
 0x246   :  { %v755_v41 = vmul.f32 %v1692_v50, %v754_v25 }
 0x247   :  { %v1694_v44 = vpop.eup %1693  ;;  %v737_v47 = vadd.f32 %v1690_v34, %v736_v21 }
 0x248   :  { %v756_v33 = vadd.f32 %v1692_v50, %v755_v41  ;;  %v773_v40 = vmul.f32 %v1694_v44, %v771_v30  ;;  %v1696_v35 = vpop.eup %1695  ;;  %vm778_vm2 = vweird.f32 %v1694_v44  ;;  %v3185_v41 = vld [vmem:[#allocation15_spill] sm:$0xff] }
 0x249   :  { %v741_v51 = vsel %vm740_vm14, %v1690_v34, %v737_v47  ;;  %v781_v34 = vand.u32 2147483647, %v771_v30  ;;  %vm779_vm4 = vmor %vm777_vm3, %vm778_vm2  ;;  %v3184_v30 = vld [vmem:[#allocation10_spill] sm:$0xff] }
 0x24a   :  { %v746_v31 = vsel %vm743_vm0, %v745_v43, %v741_v51  ;;  %v760_v38 = vsel %vm759_vm15, %v1692_v50, %v756_v33  ;;  %v774_v28 = vsub.f32 1.0, %v773_v40  ;;  %v2756_v47 = vld [vmem:[#allocation2 + $0x90] sm:$0xff]  ;;  %v3187_v43 = vld [vmem:[#allocation24_spill] sm:$0xff] }
 0x24b   :  { %v765_v25 = vsel %vm762_vm1, %v764_v37, %v760_v38  ;;  %v788_v27 = vmul.f32 %v1696_v35, %v746_v31  ;;  %vm782_vm5 = vcmp.eq.f32.partialorder %v781_v34, 8.507059e+37  ;;  %v2750_v31 = vld [vmem:[#allocation2 + $0xb0] sm:$0xff]  ;;  %3186 = vst [vmem:[#allocation22_spill] sm:$0xff] %v2756_v47  ;;  %v3188_v33 = vld [vmem:[#allocation20_spill] sm:$0xff]  ;;  %v3189_v37 = vld [vmem:[#allocation11_spill] sm:$0xff] }
 0x24c   :  { %v787_v26 = vmul.f32 %v765_v25, %v2531_v36  ;;  %v775_v21 = vmul.f32 %v1694_v44, %v774_v28  ;;  %v3178_v36 = vld [vmem:[#allocation13_spill] sm:$0xff]  ;;  %v3181_v28 = vld [vmem:[#allocation18_spill] sm:$0xff]  ;;  %3182 = vst [vmem:[#allocation14_spill] sm:$0xff] %v2750_v31  ;;  %v2765_v35 = vld [vmem:[#allocation2 + $0x78] sm:$0xff] }
 0x24d   :  { %v2762_v51 = vld [vmem:[#allocation2 + $0x70] sm:$0xff]  ;;  %3191 = vst [vmem:[#allocation27_spill] sm:$0xff] %v2765_v35  ;;  %v3192_v38 = vld [vmem:[#allocation19_spill] sm:$0xff]  ;;  %v2769_v25 = vld [vmem:[#allocation2 + $0x48] sm:$0xff] }
 0x24e   :  { %v2705_v48 = vadd.f32 %v788_v27, %v787_v26  ;;  %v776_v42 = vadd.f32 %v1694_v44, %v775_v21  ;;  %v3179_v26 = vld [vmem:[#allocation9_spill] sm:$0xff]  ;;  %v3180_v27 = vld [vmem:[#allocation12_spill] sm:$0xff]  ;;  %3190 = vst [vmem:[#allocation29_spill] sm:$0xff] %v2762_v51  ;;  %v2772_v21 = vld [vmem:[#allocation2 + $0x50] sm:$0xff] }
 0x24f   :  { %3193 = vst [vmem:[#allocation17_spill] sm:$0xff] %v2769_v25  ;;  %v2779_v34 = vld [vmem:[#allocation2 + $0x28] sm:$0xff] }
 0x250   :  { %1697 = vtanh.f32 %v2705_v48  ;;  %v780_v39 = vsel %vm779_vm4, %v1694_v44, %v776_v42  ;;  %v3183_v44 = vld [vmem:[#allocation16_spill] sm:$0xff]  ;;  %3194 = vst [vmem:[#allocation25_spill] sm:$0xff] %v2772_v21  ;;  %v2775_v42 = vld [vmem:[#allocation2 + $0x58] sm:$0xff] }
 0x251   :  { %v785_v40 = vsel %vm782_vm5, %v784_v29, %v780_v39  ;;  %3195 = vst [vmem:[#allocation32_spill] sm:$0xff] %v2775_v42  ;;  %v2782_v39 = vld [vmem:[#allocation2 + $0x30] sm:$0xff]  ;;  %v2785_v29 = vld [vmem:[#allocation2 + $0x38] sm:$0xff] }
 0x252   :  { %3197 = vst [vmem:[#allocation30_spill] sm:$0xff] %v2779_v34 }
 0x253   :  { %3198 = vst [vmem:[#allocation21_spill] sm:$0xff] %v2782_v39 }
 0x254   :  { %3199 = vst [vmem:[#allocation28_spill] sm:$0xff] %v2785_v29 }
 0x256   :  { %v1698_v46 = vpop.eup %1697 }
 0x257   :  { %v791_v50 = vmul.f32 %v1698_v46, %v785_v40  ;;  %v3200_v46 = vld [vmem:[#allocation23_spill] sm:$0xff]  ;;  %v2789_v40 = vld [vmem:[#allocation2 + $0x8] sm:$0xff] }
 0x258   :  { %3201 = vst [vmem:[#allocation33_spill] sm:$0xff] %v2789_v40 }
 0x259   :  { %808 = vmatmul.f32.vlgmr.msra.gmra.mxu0 %v791_v50  ;;  %828 = vmatmul.f32.vlgmr.msrb.gmra.mxu1 %v791_v50 }
 0x25a   :  { %848 = vmatmul.f32.vlgmr.msrb.gmra.mxu2 %v791_v50  ;;  %868 = vmatmul.f32.vlgmr.msrb.gmra.mxu3 %v791_v50  ;;  %v2792_v50 = vld [vmem:[#allocation2 + $0x10] sm:$0xff] }
 0x25b   :  { %1086 = vmatpush.msra.mxu0 %v2534_v54  ;;  %1106 = vmatpush.msrb.mxu1 %v2537_v52  ;;  %3202 = vst [vmem:[#allocation31_spill] sm:$0xff] %v2792_v50 }
 0x25c   :  { %1126 = vmatpush.msrb.mxu2 %v2540_v53  ;;  %1146 = vmatpush.msrb.mxu3 %v2543_v55 }
 0x25d   :  { %1087 = vmatpush.msra.mxu0 %v2546_v56  ;;  %1107 = vmatpush.msrb.mxu1 %v2549_v57 }
 0x25e   :  { %1127 = vmatpush.msrb.mxu2 %v2552_v62  ;;  %1147 = vmatpush.msrb.mxu3 %v2555_v0 }
 0x25f   :  { %1088 = vmatpush.msra.mxu0 %v2558_v4  ;;  %1108 = vmatpush.msrb.mxu1 %v2561_v32 }
 0x260   :  { %1128 = vmatpush.msrb.mxu2 %v2564_v2  ;;  %1148 = vmatpush.msrb.mxu3 %v2567_v13 }
 0x261   :  { %1089 = vmatpush.msra.mxu0 %v2570_v17  ;;  %1109 = vmatpush.msrb.mxu1 %v2573_v19 }
 0x262   :  { %1129 = vmatpush.msrb.mxu2 %v2576_v6  ;;  %1149 = vmatpush.msrb.mxu3 %v2579_v16 }
 0x263   :  { %1090 = vmatpush.msra.mxu0 %v2582_v45  ;;  %1110 = vmatpush.msrb.mxu1 %v2585_v10 }
 0x264   :  { %1130 = vmatpush.msrb.mxu2 %v2588_v63  ;;  %1150 = vmatpush.msrb.mxu3 %v2591_v1 }
 0x265   :  { %1091 = vmatpush.msra.mxu0 %v2594_v60  ;;  %1111 = vmatpush.msrb.mxu1 %v2597_v8 }
 0x266   :  { %1131 = vmatpush.msrb.mxu2 %v2600_v3  ;;  %1151 = vmatpush.msrb.mxu3 %v2603_v5 }
 0x267   :  { %1092 = vmatpush.msra.mxu0 %v2606_v9  ;;  %1112 = vmatpush.msrb.mxu1 %v2609_v59 }
 0x268   :  { %1132 = vmatpush.msrb.mxu2 %v2612_v12  ;;  %1152 = vmatpush.msrb.mxu3 %v2615_v61 }
 0x269   :  { %1093 = vmatpush.msra.mxu0 %v2618_v15  ;;  %1113 = vmatpush.msrb.mxu1 %v2621_v58 }
 0x26a   :  { %1133 = vmatpush.msrb.mxu2 %v2624_v11  ;;  %1153 = vmatpush.msrb.mxu3 %v2627_v7 }
 0x26b   :  { %1094 = vmatpush.msra.mxu0 %v2630_v14  ;;  %1114 = vmatpush.msrb.mxu1 %v2633_v18 }
 0x26c   :  { %1134 = vmatpush.msrb.mxu2 %v2636_v20  ;;  %1154 = vmatpush.msrb.mxu3 %v2639_v22 }
 0x26d   :  { %1095 = vmatpush.msra.mxu0 %v2642_v23  ;;  %1115 = vmatpush.msrb.mxu1 %v2645_v24 }
 0x26e   :  { %1135 = vmatpush.msrb.mxu2 %v3178_v36  ;;  %1155 = vmatpush.msrb.mxu3 %v3179_v26 }
 0x26f   :  { %1096 = vmatpush.msra.mxu0 %v3180_v27  ;;  %1116 = vmatpush.msrb.mxu1 %v3181_v28 }
 0x270   :  { %1136 = vmatpush.msrb.mxu2 %v2750_v31  ;;  %1156 = vmatpush.msrb.mxu3 %v3183_v44 }
 0x271   :  { %1097 = vmatpush.msra.mxu0 %v3184_v30  ;;  %1117 = vmatpush.msrb.mxu1 %v3185_v41 }
 0x272   :  { %1137 = vmatpush.msrb.mxu2 %v2756_v47  ;;  %1157 = vmatpush.msrb.mxu3 %v3187_v43 }
 0x273   :  { %1098 = vmatpush.msra.mxu0 %v3188_v33  ;;  %1118 = vmatpush.msrb.mxu1 %v3189_v37 }
 0x274   :  { %1138 = vmatpush.msrb.mxu2 %v2762_v51  ;;  %1158 = vmatpush.msrb.mxu3 %v2765_v35 }
 0x275   :  { %1099 = vmatpush.msra.mxu0 %v3192_v38  ;;  %1119 = vmatpush.msrb.mxu1 %v2769_v25  ;;  %v3205_v25 = vld [vmem:[#allocation45_spill] sm:$0xff] }
 0x276   :  { %1139 = vmatpush.msrb.mxu2 %v2772_v21  ;;  %1159 = vmatpush.msrb.mxu3 %v2775_v42  ;;  %v3204_v42 = vld [vmem:[#allocation41_spill] sm:$0xff] }
 0x277   :  { %1100 = vmatpush.msra.mxu0 %v3196_v49  ;;  %1120 = vmatpush.msrb.mxu1 %v2779_v34  ;;  %v2795_v49 = vld [vmem:[#allocation2 + $0x18] sm:$0xff] }
 0x278   :  { %1140 = vmatpush.msrb.mxu2 %v2782_v39  ;;  %1160 = vmatpush.msrb.mxu3 %v2785_v29  ;;  %3203 = vst [vmem:[#allocation36_spill] sm:$0xff] %v2795_v49 }
 0x279   :  { %1101 = vmatpush.msra.mxu0 %v3200_v46  ;;  %1121 = vmatpush.msrb.mxu1 %v2789_v40  ;;  %v3206_v40 = vld [vmem:[#allocation48_spill] sm:$0xff] }
 0x27a   :  { %1141 = vmatpush.msrb.mxu2 %v2792_v50  ;;  %1161 = vmatpush.msrb.mxu3 %v2795_v49 }
 0x2d6   :  { %v809_v34 = vpop.f32.mrf.mxu0  ;;  %v829_v39 = vpop.f32.mrf.mxu1 }
 0x2d7   :  { %v872_v21 = vadd.f32 %v809_v34, %v3204_v42  ;;  %v873_v29 = vadd.f32 %v829_v39, %v3205_v25  ;;  %v3207_v25 = vld [vmem:[#allocation47_spill] sm:$0xff] }
 0x2d9   :  { %v1619_v38 = vmul.f32 -1.442695, %v872_v21  ;;  %v1620_v46 = vmul.f32 -1.442695, %v873_v29 }
 0x2db   :  { %1699 = vpow2.f32 %v1619_v38 }
 0x2dc   :  { %1701 = vpow2.f32 %v1620_v46 }
 0x2dd   :  { %v869_v35 = vpop.f32.mrf.mxu3  ;;  %v849_v49 = vpop.f32.mrf.mxu2 }
 0x2de   :  { %v875_v51 = vadd.f32 %v869_v35, %v3206_v40  ;;  %v874_v21 = vadd.f32 %v849_v49, %v3207_v25 }
 0x2e0   :  { %v1621_v37 = vmul.f32 -1.442695, %v875_v51 }
 0x2e1   :  { %v1700_v33 = vpop.eup %1699 }
 0x2e2   :  { %v1702_v50 = vpop.eup %1701  ;;  %v879_v43 = vadd.f32 1.0, %v1700_v33  ;;  %1703 = vpow2.f32 %v1621_v37 }
 0x2e3   :  { %v898_v47 = vadd.f32 1.0, %v1702_v50 }
 0x2e4   :  { %1705 = vrcp.f32 %v879_v43  ;;  %v891_v51 = vand.u32 2147483648, %v879_v43  ;;  %v889_v37 = vand.u32 2147483647, %v879_v43  ;;  %vm885_vm8 = vweird.f32 %v879_v43 }
 0x2e5   :  { %1707 = vrcp.f32 %v898_v47  ;;  %v910_v40 = vand.u32 2147483648, %v898_v47  ;;  %v908_v30 = vand.u32 2147483647, %v898_v47  ;;  %vm904_vm9 = vweird.f32 %v898_v47 }
 0x2e6   :  { %v892_v49 = vor.u32 1.1754944e-38, %v891_v51  ;;  %vm890_vm12 = vcmp.eq.f32.partialorder %v889_v37, 8.507059e+37 }
 0x2e7   :  { %vm909_vm13 = vcmp.eq.f32.partialorder %v908_v30, 8.507059e+37 }
 0x2e8   :  { %v1704_v41 = vpop.eup %1703 }
 0x2e9   :  { %v918_v42 = vadd.f32 1.0, %v1704_v41 }
 0x2ea   :  { %v1706_v34 = vpop.eup %1705 }
 0x2eb   :  { %v1708_v39 = vpop.eup %1707  ;;  %v881_v38 = vmul.f32 %v1706_v34, %v879_v43  ;;  %1709 = vrcp.f32 %v918_v42  ;;  %vm886_vm6 = vweird.f32 %v1706_v34  ;;  %v930_v51 = vand.u32 2147483648, %v918_v42 }
 0x2ec   :  { %v900_v29 = vmul.f32 %v1708_v39, %v898_v47  ;;  %1711 = vtanh.f32 %v874_v21  ;;  %vm905_vm7 = vweird.f32 %v1708_v39  ;;  %vm887_vm10 = vmor %vm885_vm8, %vm886_vm6  ;;  %vm924_vm15 = vweird.f32 %v918_v42 }
 0x2ed   :  { %v882_v46 = vsub.f32 1.0, %v881_v38  ;;  %vm906_vm11 = vmor %vm904_vm9, %vm905_vm7  ;;  %v911_v38 = vor.u32 1.1754944e-38, %v910_v40  ;;  %v931_v37 = vor.u32 1.1754944e-38, %v930_v51  ;;  %v3226_v51 = vld [vmem:[#allocation26_spill] sm:$0xff] }
 0x2ee   :  { %v901_v35 = vsub.f32 1.0, %v900_v29 }
 0x2ef   :  { %v883_v33 = vmul.f32 %v1706_v34, %v882_v46 }
 0x2f0   :  { %v902_v50 = vmul.f32 %v1708_v39, %v901_v35 }
 0x2f1   :  { %v1710_v44 = vpop.eup %1709  ;;  %v884_v41 = vadd.f32 %v1706_v34, %v883_v33 }
 0x2f2   :  { %v903_v25 = vadd.f32 %v1708_v39, %v902_v50  ;;  %v920_v31 = vmul.f32 %v1710_v44, %v918_v42  ;;  %v1712_v21 = vpop.eup %1711  ;;  %vm925_vm14 = vweird.f32 %v1710_v44  ;;  %v3215_v50 = vld [vmem:[#allocation15_spill] sm:$0xff] }
 0x2f3   :  { %v888_v29 = vsel %vm887_vm10, %v1706_v34, %v884_v41  ;;  %v928_v34 = vand.u32 2147483647, %v918_v42  ;;  %vm926_vm0 = vmor %vm924_vm15, %vm925_vm14  ;;  %v3214_v42 = vld [vmem:[#allocation10_spill] sm:$0xff] }
 0x2f4   :  { %v893_v28 = vsel %vm890_vm12, %v892_v49, %v888_v29  ;;  %v907_v46 = vsel %vm906_vm11, %v1708_v39, %v903_v25  ;;  %v921_v27 = vsub.f32 1.0, %v920_v31  ;;  %v3216_v41 = vld [vmem:[#allocation22_spill] sm:$0xff]  ;;  %v3217_v49 = vld [vmem:[#allocation24_spill] sm:$0xff]  ;;  %v3220_v29 = vld [vmem:[#allocation29_spill] sm:$0xff] }
 0x2f5   :  { %v912_v35 = vsel %vm909_vm13, %v911_v38, %v907_v46  ;;  %v935_v26 = vmul.f32 %v1712_v21, %v893_v28  ;;  %vm929_vm1 = vcmp.eq.f32.partialorder %v928_v34, 8.507059e+37  ;;  %v3212_v28 = vld [vmem:[#allocation14_spill] sm:$0xff]  ;;  %v3218_v25 = vld [vmem:[#allocation20_spill] sm:$0xff]  ;;  %v3219_v38 = vld [vmem:[#allocation11_spill] sm:$0xff] }
 0x2f6   :  { %v934_v36 = vmul.f32 %v912_v35, %v2705_v48  ;;  %v922_v33 = vmul.f32 %v1710_v44, %v921_v27  ;;  %v3208_v48 = vld [vmem:[#allocation13_spill] sm:$0xff]  ;;  %v3211_v27 = vld [vmem:[#allocation18_spill] sm:$0xff]  ;;  %v3221_v21 = vld [vmem:[#allocation27_spill] sm:$0xff] }
 0x2f7   :  { %v3222_v46 = vld [vmem:[#allocation19_spill] sm:$0xff]  ;;  %v3223_v35 = vld [vmem:[#allocation17_spill] sm:$0xff]  ;;  %v3227_v34 = vld [vmem:[#allocation30_spill] sm:$0xff] }
 0x2f8   :  { %v2803_v43 = vadd.f32 %v935_v26, %v934_v36  ;;  %v923_v47 = vadd.f32 %v1710_v44, %v922_v33  ;;  %v3209_v36 = vld [vmem:[#allocation9_spill] sm:$0xff]  ;;  %v3210_v26 = vld [vmem:[#allocation12_spill] sm:$0xff] }
 0x2f9   :  { %v3224_v33 = vld [vmem:[#allocation25_spill] sm:$0xff] }
 0x2fa   :  { %1713 = vtanh.f32 %v2803_v43  ;;  %v927_v40 = vsel %vm926_vm0, %v1710_v44, %v923_v47  ;;  %v3213_v44 = vld [vmem:[#allocation16_spill] sm:$0xff] }
 0x2fb   :  { %v932_v31 = vsel %vm929_vm1, %v931_v37, %v927_v40  ;;  %v3225_v47 = vld [vmem:[#allocation32_spill] sm:$0xff]  ;;  %v3228_v40 = vld [vmem:[#allocation21_spill] sm:$0xff] }
 0x2fc   :  { %v3229_v37 = vld [vmem:[#allocation28_spill] sm:$0xff] }
 0x300   :  { %v1714_v30 = vpop.eup %1713 }
 0x301   :  { %v938_v39 = vmul.f32 %v1714_v30, %v932_v31  ;;  %v3230_v30 = vld [vmem:[#allocation23_spill] sm:$0xff]  ;;  %v3231_v31 = vld [vmem:[#allocation33_spill] sm:$0xff] }
 0x303   :  { %955 = vmatmul.f32.vlgmr.msrb.gmra.mxu0 %v938_v39  ;;  %975 = vmatmul.f32.vlgmr.msra.gmra.mxu1 %v938_v39 }
 0x304   :  { %995 = vmatmul.f32.vlgmr.msra.gmra.mxu2 %v938_v39  ;;  %1015 = vmatmul.f32.vlgmr.msra.gmra.mxu3 %v938_v39  ;;  %v3232_v39 = vld [vmem:[#allocation31_spill] sm:$0xff] }
 0x305   :  { %1233 = vmatpush.msrb.mxu0 %v2534_v54  ;;  %1253 = vmatpush.msra.mxu1 %v2537_v52 }
 0x306   :  { %1273 = vmatpush.msra.mxu2 %v2540_v53  ;;  %1293 = vmatpush.msra.mxu3 %v2543_v55 }
 0x307   :  { %1234 = vmatpush.msrb.mxu0 %v2546_v56  ;;  %1254 = vmatpush.msra.mxu1 %v2549_v57 }
 0x308   :  { %1274 = vmatpush.msra.mxu2 %v2552_v62  ;;  %1294 = vmatpush.msra.mxu3 %v2555_v0 }
 0x309   :  { %1235 = vmatpush.msrb.mxu0 %v2558_v4  ;;  %1255 = vmatpush.msra.mxu1 %v2561_v32 }
 0x30a   :  { %1275 = vmatpush.msra.mxu2 %v2564_v2  ;;  %1295 = vmatpush.msra.mxu3 %v2567_v13 }
 0x30b   :  { %1236 = vmatpush.msrb.mxu0 %v2570_v17  ;;  %1256 = vmatpush.msra.mxu1 %v2573_v19 }
 0x30c   :  { %1276 = vmatpush.msra.mxu2 %v2576_v6  ;;  %1296 = vmatpush.msra.mxu3 %v2579_v16 }
 0x30d   :  { %1237 = vmatpush.msrb.mxu0 %v2582_v45  ;;  %1257 = vmatpush.msra.mxu1 %v2585_v10 }
 0x30e   :  { %1277 = vmatpush.msra.mxu2 %v2588_v63  ;;  %1297 = vmatpush.msra.mxu3 %v2591_v1 }
 0x30f   :  { %1238 = vmatpush.msrb.mxu0 %v2594_v60  ;;  %1258 = vmatpush.msra.mxu1 %v2597_v8 }
 0x310   :  { %1278 = vmatpush.msra.mxu2 %v2600_v3  ;;  %1298 = vmatpush.msra.mxu3 %v2603_v5 }
 0x311   :  { %1239 = vmatpush.msrb.mxu0 %v2606_v9  ;;  %1259 = vmatpush.msra.mxu1 %v2609_v59 }
 0x312   :  { %1279 = vmatpush.msra.mxu2 %v2612_v12  ;;  %1299 = vmatpush.msra.mxu3 %v2615_v61 }
 0x313   :  { %1240 = vmatpush.msrb.mxu0 %v2618_v15  ;;  %1260 = vmatpush.msra.mxu1 %v2621_v58 }
 0x314   :  { %1280 = vmatpush.msra.mxu2 %v2624_v11  ;;  %1300 = vmatpush.msra.mxu3 %v2627_v7 }
 0x315   :  { %1241 = vmatpush.msrb.mxu0 %v2630_v14  ;;  %1261 = vmatpush.msra.mxu1 %v2633_v18 }
 0x316   :  { %1281 = vmatpush.msra.mxu2 %v2636_v20  ;;  %1301 = vmatpush.msra.mxu3 %v2639_v22 }
 0x317   :  { %1242 = vmatpush.msrb.mxu0 %v2642_v23  ;;  %1262 = vmatpush.msra.mxu1 %v2645_v24 }
 0x318   :  { %1282 = vmatpush.msra.mxu2 %v3208_v48  ;;  %1302 = vmatpush.msra.mxu3 %v3209_v36 }
 0x319   :  { %1243 = vmatpush.msrb.mxu0 %v3210_v26  ;;  %1263 = vmatpush.msra.mxu1 %v3211_v27 }
 0x31a   :  { %1283 = vmatpush.msra.mxu2 %v3212_v28  ;;  %1303 = vmatpush.msra.mxu3 %v3213_v44 }
 0x31b   :  { %1244 = vmatpush.msrb.mxu0 %v3214_v42  ;;  %1264 = vmatpush.msra.mxu1 %v3215_v50 }
 0x31c   :  { %1284 = vmatpush.msra.mxu2 %v3216_v41  ;;  %1304 = vmatpush.msra.mxu3 %v3217_v49 }
 0x31d   :  { %1245 = vmatpush.msrb.mxu0 %v3218_v25  ;;  %1265 = vmatpush.msra.mxu1 %v3219_v38 }
 0x31e   :  { %1285 = vmatpush.msra.mxu2 %v3220_v29  ;;  %1305 = vmatpush.msra.mxu3 %v3221_v21  ;;  %v3234_v21 = vld [vmem:[#allocation46_spill] sm:$0xff]  ;;  %v3235_v29 = vld [vmem:[#allocation49_spill] sm:$0xff] }
 0x31f   :  { %1246 = vmatpush.msrb.mxu0 %v3222_v46  ;;  %1266 = vmatpush.msra.mxu1 %v3223_v35  ;;  %v3233_v46 = vld [vmem:[#allocation36_spill] sm:$0xff] }
 0x320   :  { %1286 = vmatpush.msra.mxu2 %v3224_v33  ;;  %1306 = vmatpush.msra.mxu3 %v3225_v47 }
 0x321   :  { %1247 = vmatpush.msrb.mxu0 %v3226_v51  ;;  %1267 = vmatpush.msra.mxu1 %v3227_v34 }
 0x322   :  { %1287 = vmatpush.msra.mxu2 %v3228_v40  ;;  %1307 = vmatpush.msra.mxu3 %v3229_v37  ;;  %v3236_v37 = vld [vmem:[#allocation51_spill] sm:$0xff] }
 0x323   :  { %1248 = vmatpush.msrb.mxu0 %v3230_v30  ;;  %1268 = vmatpush.msra.mxu1 %v3231_v31 }
 0x324   :  { %1288 = vmatpush.msra.mxu2 %v3232_v39  ;;  %1308 = vmatpush.msra.mxu3 %v3233_v46 }
 0x380   :  { %v956_v35 = vpop.f32.mrf.mxu0  ;;  %v976_v33 = vpop.f32.mrf.mxu1 }
 0x381   :  { %v1019_v47 = vadd.f32 %v956_v35, %v3234_v21  ;;  %v1020_v51 = vadd.f32 %v976_v33, %v3235_v29  ;;  %v3237_v29 = vld [vmem:[#allocation50_spill] sm:$0xff] }
 0x383   :  { %v1622_v38 = vmul.f32 -1.442695, %v1019_v47  ;;  %v1623_v34 = vmul.f32 -1.442695, %v1020_v51 }
 0x385   :  { %1715 = vpow2.f32 %v1622_v38 }
 0x386   :  { %1717 = vpow2.f32 %v1623_v34 }
 0x387   :  { %v1016_v40 = vpop.f32.mrf.mxu3  ;;  %v996_v46 = vpop.f32.mrf.mxu2 }
 0x388   :  { %v1022_v25 = vadd.f32 %v1016_v40, %v3236_v37  ;;  %v1021_v33 = vadd.f32 %v996_v46, %v3237_v29 }
 0x38a   :  { %v1624_v30 = vmul.f32 -1.442695, %v1022_v25 }
 0x38b   :  { %v1716_v49 = vpop.eup %1715 }
 0x38c   :  { %v1718_v31 = vpop.eup %1717  ;;  %v1026_v41 = vadd.f32 1.0, %v1716_v49  ;;  %1719 = vpow2.f32 %v1624_v30 }
 0x38d   :  { %v1045_v39 = vadd.f32 1.0, %v1718_v31 }
 0x38e   :  { %1721 = vrcp.f32 %v1026_v41  ;;  %v1038_v25 = vand.u32 2147483648, %v1026_v41  ;;  %v1036_v30 = vand.u32 2147483647, %v1026_v41  ;;  %vm1032_vm4 = vweird.f32 %v1026_v41 }
 0x38f   :  { %1723 = vrcp.f32 %v1045_v39  ;;  %v1057_v37 = vand.u32 2147483648, %v1045_v39  ;;  %v1055_v42 = vand.u32 2147483647, %v1045_v39  ;;  %vm1051_vm5 = vweird.f32 %v1045_v39 }
 0x390   :  { %v1039_v46 = vor.u32 1.1754944e-38, %v1038_v25  ;;  %vm1037_vm8 = vcmp.eq.f32.partialorder %v1036_v30, 8.507059e+37 }
 0x391   :  { %vm1056_vm9 = vcmp.eq.f32.partialorder %v1055_v42, 8.507059e+37 }
 0x392   :  { %v1720_v50 = vpop.eup %1719 }
 0x393   :  { %v1065_v21 = vadd.f32 1.0, %v1720_v50 }
 0x394   :  { %v1722_v35 = vpop.eup %1721 }
 0x395   :  { %v1724_v47 = vpop.eup %1723  ;;  %v1028_v38 = vmul.f32 %v1722_v35, %v1026_v41  ;;  %1725 = vrcp.f32 %v1065_v21  ;;  %vm1033_vm2 = vweird.f32 %v1722_v35  ;;  %v1077_v25 = vand.u32 2147483648, %v1065_v21 }
 0x396   :  { %v1047_v51 = vmul.f32 %v1724_v47, %v1045_v39  ;;  %1727 = vtanh.f32 %v1021_v33  ;;  %vm1052_vm3 = vweird.f32 %v1724_v47  ;;  %vm1034_vm6 = vmor %vm1032_vm4, %vm1033_vm2  ;;  %vm1071_vm11 = vweird.f32 %v1065_v21 }
 0x397   :  { %v1029_v34 = vsub.f32 1.0, %v1028_v38  ;;  %vm1053_vm7 = vmor %vm1051_vm5, %vm1052_vm3  ;;  %v1058_v38 = vor.u32 1.1754944e-38, %v1057_v37  ;;  %v1078_v30 = vor.u32 1.1754944e-38, %v1077_v25 }
 0x398   :  { %v1048_v40 = vsub.f32 1.0, %v1047_v51 }
 0x399   :  { %v1030_v49 = vmul.f32 %v1722_v35, %v1029_v34 }
 0x39a   :  { %v1049_v31 = vmul.f32 %v1724_v47, %v1048_v40 }
 0x39b   :  { %v1726_v44 = vpop.eup %1725  ;;  %v1031_v50 = vadd.f32 %v1722_v35, %v1030_v49 }
 0x39c   :  { %v1050_v29 = vadd.f32 %v1724_v47, %v1049_v31  ;;  %v1067_v28 = vmul.f32 %v1726_v44, %v1065_v21  ;;  %v1728_v33 = vpop.eup %1727  ;;  %vm1072_vm10 = vweird.f32 %v1726_v44 }
 0x39d   :  { %v1035_v51 = vsel %vm1034_vm6, %v1722_v35, %v1031_v50  ;;  %v1075_v35 = vand.u32 2147483647, %v1065_v21  ;;  %vm1073_vm12 = vmor %vm1071_vm11, %vm1072_vm10  ;;  %v3267_v50 = vld [vmem:[#allocation53_spill] sm:$0xff] }
 0x39e   :  { %v1040_v27 = vsel %vm1037_vm8, %v1039_v46, %v1035_v51  ;;  %v1054_v34 = vsel %vm1053_vm7, %v1724_v47, %v1050_v29  ;;  %v1068_v26 = vsub.f32 1.0, %v1067_v28 }
 0x39f   :  { %v1059_v40 = vsel %vm1056_vm9, %v1058_v38, %v1054_v34  ;;  %v1082_v36 = vmul.f32 %v1728_v33, %v1040_v27  ;;  %vm1076_vm13 = vcmp.eq.f32.partialorder %v1075_v35, 8.507059e+37 }
 0x3a0   :  { %v1081_v48 = vmul.f32 %v1059_v40, %v2803_v43  ;;  %v1069_v49 = vmul.f32 %v1726_v44, %v1068_v26 }
 0x3a2   :  { %v2875_v41 = vadd.f32 %v1082_v36, %v1081_v48  ;;  %v1070_v39 = vadd.f32 %v1726_v44, %v1069_v49 }
 0x3a4   :  { %1729 = vtanh.f32 %v2875_v41  ;;  %v1074_v37 = vsel %vm1073_vm12, %v1726_v44, %v1070_v39 }
 0x3a5   :  { %v1079_v28 = vsel %vm1076_vm13, %v1078_v30, %v1074_v37 }
 0x3aa   :  { %v1730_v42 = vpop.eup %1729 }
 0x3ab   :  { %v1085_v47 = vmul.f32 %v1730_v42, %v1079_v28 }
 0x3ad   :  { %1102 = vmatmul.f32.vlgmr.msra.gmra.mxu0 %v1085_v47  ;;  %1122 = vmatmul.f32.vlgmr.msrb.gmra.mxu1 %v1085_v47 }
 0x3ae   :  { %1142 = vmatmul.f32.vlgmr.msrb.gmra.mxu2 %v1085_v47  ;;  %1162 = vmatmul.f32.vlgmr.msrb.gmra.mxu3 %v1085_v47 }
 0x3af   :  { %1380 = vmatpush.msra.mxu0 %v2534_v54  ;;  %1400 = vmatpush.msrb.mxu1 %v2537_v52  ;;  %v3238_v54 = vld [vmem:[#allocation13_spill] sm:$0xff] }
 0x3b0   :  { %1420 = vmatpush.msrb.mxu2 %v2540_v53  ;;  %1440 = vmatpush.msrb.mxu3 %v2543_v55  ;;  %v3239_v52 = vld [vmem:[#allocation9_spill] sm:$0xff]  ;;  %v3240_v53 = vld [vmem:[#allocation12_spill] sm:$0xff]  ;;  %v3241_v55 = vld [vmem:[#allocation18_spill] sm:$0xff] }
 0x3b1   :  { %1381 = vmatpush.msra.mxu0 %v2546_v56  ;;  %1401 = vmatpush.msrb.mxu1 %v2549_v57  ;;  %v3242_v56 = vld [vmem:[#allocation14_spill] sm:$0xff]  ;;  %v3243_v57 = vld [vmem:[#allocation16_spill] sm:$0xff] }
 0x3b2   :  { %1421 = vmatpush.msrb.mxu2 %v2552_v62  ;;  %1441 = vmatpush.msrb.mxu3 %v2555_v0  ;;  %v3244_v62 = vld [vmem:[#allocation10_spill] sm:$0xff]  ;;  %v3245_v0 = vld [vmem:[#allocation15_spill] sm:$0xff] }
 0x3b3   :  { %1382 = vmatpush.msra.mxu0 %v2558_v4  ;;  %1402 = vmatpush.msrb.mxu1 %v2561_v32  ;;  %v3246_v4 = vld [vmem:[#allocation22_spill] sm:$0xff]  ;;  %v3247_v32 = vld [vmem:[#allocation24_spill] sm:$0xff] }
 0x3b4   :  { %1422 = vmatpush.msrb.mxu2 %v2564_v2  ;;  %1442 = vmatpush.msrb.mxu3 %v2567_v13  ;;  %v3248_v2 = vld [vmem:[#allocation20_spill] sm:$0xff]  ;;  %v3249_v13 = vld [vmem:[#allocation11_spill] sm:$0xff] }
 0x3b5   :  { %1383 = vmatpush.msra.mxu0 %v2570_v17  ;;  %1403 = vmatpush.msrb.mxu1 %v2573_v19  ;;  %v3250_v17 = vld [vmem:[#allocation29_spill] sm:$0xff]  ;;  %v3251_v19 = vld [vmem:[#allocation27_spill] sm:$0xff] }
 0x3b6   :  { %1423 = vmatpush.msrb.mxu2 %v2576_v6  ;;  %1443 = vmatpush.msrb.mxu3 %v2579_v16  ;;  %v3252_v6 = vld [vmem:[#allocation19_spill] sm:$0xff]  ;;  %v3253_v16 = vld [vmem:[#allocation17_spill] sm:$0xff] }
 0x3b7   :  { %1384 = vmatpush.msra.mxu0 %v2582_v45  ;;  %1404 = vmatpush.msrb.mxu1 %v2585_v10  ;;  %v3254_v45 = vld [vmem:[#allocation25_spill] sm:$0xff]  ;;  %v3255_v10 = vld [vmem:[#allocation32_spill] sm:$0xff] }
 0x3b8   :  { %1424 = vmatpush.msrb.mxu2 %v2588_v63  ;;  %1444 = vmatpush.msrb.mxu3 %v2591_v1  ;;  %v3256_v63 = vld [vmem:[#allocation26_spill] sm:$0xff] }
 0x3b9   :  { %1385 = vmatpush.msra.mxu0 %v2594_v60  ;;  %1405 = vmatpush.msrb.mxu1 %v2597_v8  ;;  %v3257_v1 = vld [vmem:[#allocation30_spill] sm:$0xff]  ;;  %v3258_v60 = vld [vmem:[#allocation21_spill] sm:$0xff]  ;;  %v3259_v8 = vld [vmem:[#allocation28_spill] sm:$0xff] }
 0x3ba   :  { %1425 = vmatpush.msrb.mxu2 %v2600_v3  ;;  %1445 = vmatpush.msrb.mxu3 %v2603_v5  ;;  %v3260_v3 = vld [vmem:[#allocation23_spill] sm:$0xff]  ;;  %v3261_v5 = vld [vmem:[#allocation33_spill] sm:$0xff] }
 0x3bb   :  { %1386 = vmatpush.msra.mxu0 %v2606_v9  ;;  %1406 = vmatpush.msrb.mxu1 %v2609_v59  ;;  %v3262_v9 = vld [vmem:[#allocation31_spill] sm:$0xff]  ;;  %v3263_v59 = vld [vmem:[#allocation36_spill] sm:$0xff] }
 0x3bc   :  { %1426 = vmatpush.msrb.mxu2 %v2612_v12  ;;  %1446 = vmatpush.msrb.mxu3 %v2615_v61 }
 0x3bd   :  { %1387 = vmatpush.msra.mxu0 %v2618_v15  ;;  %1407 = vmatpush.msrb.mxu1 %v2621_v58  ;;  %v3264_v15 = vld [vmem:[#allocation8_spill] sm:$0xff] }
 0x3be   :  { %1427 = vmatpush.msrb.mxu2 %v2624_v11  ;;  %1447 = vmatpush.msrb.mxu3 %v2627_v7  ;;  %v3265_v11 = vld [vmem:[#allocation52_spill] sm:$0xff] }
 0x3bf   :  { %1388 = vmatpush.msra.mxu0 %v2630_v14  ;;  %1408 = vmatpush.msrb.mxu1 %v2633_v18 }
 0x3c0   :  { %1428 = vmatpush.msrb.mxu2 %v2636_v20  ;;  %1448 = vmatpush.msrb.mxu3 %v2639_v22  ;;  %v3266_v22 = vld [vmem:[#allocation54_spill] sm:$0xff] }
 0x3c1   :  { %1389 = vmatpush.msra.mxu0 %v2642_v23  ;;  %1409 = vmatpush.msrb.mxu1 %v2645_v24 }
 0x3c2   :  { %1429 = vmatpush.msrb.mxu2 %v3238_v54  ;;  %1449 = vmatpush.msrb.mxu3 %v3239_v52 }
 0x3c3   :  { %1390 = vmatpush.msra.mxu0 %v3240_v53  ;;  %1410 = vmatpush.msrb.mxu1 %v3241_v55 }
 0x3c4   :  { %1430 = vmatpush.msrb.mxu2 %v3242_v56  ;;  %1450 = vmatpush.msrb.mxu3 %v3243_v57 }
 0x3c5   :  { %1391 = vmatpush.msra.mxu0 %v3244_v62  ;;  %1411 = vmatpush.msrb.mxu1 %v3245_v0 }
 0x3c6   :  { %1431 = vmatpush.msrb.mxu2 %v3246_v4  ;;  %1451 = vmatpush.msrb.mxu3 %v3247_v32 }
 0x3c7   :  { %1392 = vmatpush.msra.mxu0 %v3248_v2  ;;  %1412 = vmatpush.msrb.mxu1 %v3249_v13 }
 0x3c8   :  { %1432 = vmatpush.msrb.mxu2 %v3250_v17  ;;  %1452 = vmatpush.msrb.mxu3 %v3251_v19 }
 0x3c9   :  { %1393 = vmatpush.msra.mxu0 %v3252_v6  ;;  %1413 = vmatpush.msrb.mxu1 %v3253_v16 }
 0x3ca   :  { %1433 = vmatpush.msrb.mxu2 %v3254_v45  ;;  %1453 = vmatpush.msrb.mxu3 %v3255_v10 }
 0x3cb   :  { %1394 = vmatpush.msra.mxu0 %v3256_v63  ;;  %1414 = vmatpush.msrb.mxu1 %v3257_v1 }
 0x3cc   :  { %1434 = vmatpush.msrb.mxu2 %v3258_v60  ;;  %1454 = vmatpush.msrb.mxu3 %v3259_v8  ;;  %v3268_v8 = vld [vmem:[#allocation34_spill] sm:$0xff] }
 0x3cd   :  { %1395 = vmatpush.msra.mxu0 %v3260_v3  ;;  %1415 = vmatpush.msrb.mxu1 %v3261_v5  ;;  %v3269_v5 = vld [vmem:[#allocation55_spill] sm:$0xff] }
 0x3ce   :  { %1435 = vmatpush.msrb.mxu2 %v3262_v9  ;;  %1455 = vmatpush.msrb.mxu3 %v3263_v59 }
 0x42a   :  { %v1103_v12 = vpop.f32.mrf.mxu0  ;;  %v1123_v61 = vpop.f32.mrf.mxu1 }
 0x42b   :  { %v1166_v58 = vadd.f32 %v1103_v12, %v3264_v15  ;;  %v1167_v7 = vadd.f32 %v1123_v61, %v3265_v11  ;;  %v3270_v15 = vld [vmem:[#allocation57_spill] sm:$0xff] }
 0x42d   :  { %v1625_v14 = vmul.f32 -1.442695, %v1166_v58  ;;  %v1626_v18 = vmul.f32 -1.442695, %v1167_v7 }
 0x42f   :  { %1731 = vpow2.f32 %v1625_v14 }
 0x430   :  { %1733 = vpow2.f32 %v1626_v18 }
 0x431   :  { %v1163_v20 = vpop.f32.mrf.mxu3  ;;  %v1143_v27 = vpop.f32.mrf.mxu2 }
 0x432   :  { %v1169_v23 = vadd.f32 %v1163_v20, %v3266_v22  ;;  %v1168_v46 = vadd.f32 %v1143_v27, %v3267_v50 }
 0x434   :  { %v1627_v24 = vmul.f32 -1.442695, %v1169_v23 }
 0x435   :  { %v1732_v43 = vpop.eup %1731 }
 0x436   :  { %v1734_v48 = vpop.eup %1733  ;;  %v1173_v36 = vadd.f32 1.0, %v1732_v43  ;;  %1735 = vpow2.f32 %v1627_v24 }
 0x437   :  { %v1192_v26 = vadd.f32 1.0, %v1734_v48  ;;  %v3271_v48 = vld [vmem:[#allocation56_spill] sm:$0xff] }
 0x438   :  { %1737 = vrcp.f32 %v1173_v36  ;;  %v1185_v40 = vand.u32 2147483648, %v1173_v36  ;;  %v1183_v25 = vand.u32 2147483647, %v1173_v36  ;;  %vm1179_vm0 = vweird.f32 %v1173_v36 }
 0x439   :  { %1739 = vrcp.f32 %v1192_v26  ;;  %v1204_v49 = vand.u32 2147483648, %v1192_v26  ;;  %v1202_v37 = vand.u32 2147483647, %v1192_v26  ;;  %vm1198_vm1 = vweird.f32 %v1192_v26 }
 0x43a   :  { %v1186_v28 = vor.u32 1.1754944e-38, %v1185_v40  ;;  %vm1184_vm4 = vcmp.eq.f32.partialorder %v1183_v25, 8.507059e+37 }
 0x43b   :  { %v1205_v52 = vor.u32 1.1754944e-38, %v1204_v49  ;;  %vm1203_vm5 = vcmp.eq.f32.partialorder %v1202_v37, 8.507059e+37 }
 0x43c   :  { %v1736_v44 = vpop.eup %1735 }
 0x43d   :  { %v1212_v21 = vadd.f32 1.0, %v1736_v44 }
 0x43e   :  { %v1738_v31 = vpop.eup %1737 }
 0x43f   :  { %v1740_v29 = vpop.eup %1739  ;;  %v1175_v38 = vmul.f32 %v1738_v31, %v1173_v36  ;;  %1741 = vrcp.f32 %v1212_v21  ;;  %vm1180_vm14 = vweird.f32 %v1738_v31  ;;  %v1224_v19 = vand.u32 2147483648, %v1212_v21 }
 0x440   :  { %v1194_v51 = vmul.f32 %v1740_v29, %v1192_v26  ;;  %1743 = vtanh.f32 %v1168_v46  ;;  %vm1199_vm15 = vweird.f32 %v1740_v29  ;;  %vm1181_vm2 = vmor %vm1179_vm0, %vm1180_vm14  ;;  %vm1218_vm7 = vweird.f32 %v1212_v21 }
 0x441   :  { %v1176_v33 = vsub.f32 1.0, %v1175_v38  ;;  %vm1200_vm3 = vmor %vm1198_vm1, %vm1199_vm15  ;;  %v1222_v6 = vand.u32 2147483647, %v1212_v21  ;;  %v1225_v45 = vor.u32 1.1754944e-38, %v1224_v19 }
 0x442   :  { %v1195_v34 = vsub.f32 1.0, %v1194_v51 }
 0x443   :  { %v1177_v39 = vmul.f32 %v1738_v31, %v1176_v33  ;;  %vm1223_vm9 = vcmp.eq.f32.partialorder %v1222_v6, 8.507059e+37  ;;  %v1541_v6 = vld [vmem:[#allocation4 + $0x70] sm:$0xff] }
 0x444   :  { %v1196_v35 = vmul.f32 %v1740_v29, %v1195_v34 }
 0x445   :  { %v1742_v30 = vpop.eup %1741  ;;  %v1178_v42 = vadd.f32 %v1738_v31, %v1177_v39 }
 0x446   :  { %v1197_v47 = vadd.f32 %v1740_v29, %v1196_v35  ;;  %v1214_v54 = vmul.f32 %v1742_v30, %v1212_v21  ;;  %v1744_v55 = vpop.eup %1743  ;;  %vm1219_vm6 = vweird.f32 %v1742_v30 }
 0x447   :  { %v1182_v53 = vsel %vm1181_vm2, %v1738_v31, %v1178_v42  ;;  %vm1220_vm8 = vmor %vm1218_vm7, %vm1219_vm6 }
 0x448   :  { %v1187_v56 = vsel %vm1184_vm4, %v1186_v28, %v1182_v53  ;;  %v1201_v57 = vsel %vm1200_vm3, %v1740_v29, %v1197_v47  ;;  %v1215_v62 = vsub.f32 1.0, %v1214_v54 }
 0x449   :  { %v1206_v0 = vsel %vm1203_vm5, %v1205_v52, %v1201_v57  ;;  %v1229_v4 = vmul.f32 %v1744_v55, %v1187_v56 }
 0x44a   :  { %v1228_v32 = vmul.f32 %v1206_v0, %v2875_v41  ;;  %v1216_v2 = vmul.f32 %v1742_v30, %v1215_v62 }
 0x44c   :  { %v2947_v13 = vadd.f32 %v1229_v4, %v1228_v32  ;;  %v1217_v17 = vadd.f32 %v1742_v30, %v1216_v2 }
 0x44e   :  { %1745 = vtanh.f32 %v2947_v13  ;;  %v1221_v16 = vsel %vm1220_vm8, %v1742_v30, %v1217_v17 }
 0x44f   :  { %v1226_v63 = vsel %vm1223_vm9, %v1225_v45, %v1221_v16  ;;  %v1540_v16 = vld [vmem:[#allocation4 + $0x68] sm:$0xff]  ;;  %v1539_v45 = vld [vmem:[#allocation4 + $0x60] sm:$0xff] }
 0x454   :  { %v1746_v10 = vpop.eup %1745 }
 0x455   :  { %v1232_v1 = vmul.f32 %v1746_v10, %v1226_v63  ;;  %v1538_v10 = vld [vmem:[#allocation4 + $0x58] sm:$0xff]  ;;  %v1537_v63 = vld [vmem:[#allocation4 + $0x50] sm:$0xff] }
 0x457   :  { %1249 = vmatmul.f32.vlgmr.msrb.gmra.mxu0 %v1232_v1  ;;  %1269 = vmatmul.f32.vlgmr.msra.gmra.mxu1 %v1232_v1 }
 0x458   :  { %1289 = vmatmul.f32.vlgmr.msra.gmra.mxu2 %v1232_v1  ;;  %1309 = vmatmul.f32.vlgmr.msra.gmra.mxu3 %v1232_v1  ;;  %v1536_v1 = vld [vmem:[#allocation4 + $0x48] sm:$0xff] }
 0x4d4   :  { %v1250_v41 = vpop.f32.mrf.mxu0  ;;  %v1270_v60 = vpop.f32.mrf.mxu1 }
 0x4d5   :  { %v1313_v3 = vadd.f32 %v1250_v41, %v3268_v8  ;;  %v1314_v9 = vadd.f32 %v1270_v60, %v3269_v5  ;;  %v1535_v41 = vld [vmem:[#allocation4 + $0x40] sm:$0xff]  ;;  %v1534_v60 = vld [vmem:[#allocation4 + $0x38] sm:$0xff]  ;;  %v1533_v8 = vld [vmem:[#allocation4 + $0x30] sm:$0xff] }
 0x4d7   :  { %v1628_v59 = vmul.f32 -1.442695, %v1313_v3  ;;  %v1629_v12 = vmul.f32 -1.442695, %v1314_v9  ;;  %v3272_v9 = vld [vmem:[#allocation35_spill] sm:$0xff] }
 0x4d9   :  { %1747 = vpow2.f32 %v1628_v59 }
 0x4da   :  { %1749 = vpow2.f32 %v1629_v12  ;;  %v3273_v12 = vld [vmem:[#allocation58_spill] sm:$0xff] }
 0x4db   :  { %v1310_v61 = vpop.f32.mrf.mxu3  ;;  %v1290_v22 = vpop.f32.mrf.mxu2 }
 0x4dc   :  { %v1316_v58 = vadd.f32 %v1310_v61, %v3270_v15  ;;  %v1315_v36 = vadd.f32 %v1290_v22, %v3271_v48  ;;  %v1532_v15 = vld [vmem:[#allocation4 + $0x28] sm:$0xff] }
 0x4dd   :  { %v1528_v22 = vld [vmem:[#allocation4 + $0x8] sm:$0xff] }
 0x4de   :  { %v1630_v11 = vmul.f32 -1.442695, %v1316_v58 }
 0x4df   :  { %v1748_v7 = vpop.eup %1747 }
 0x4e0   :  { %v1750_v14 = vpop.eup %1749  ;;  %v1320_v18 = vadd.f32 1.0, %v1748_v7  ;;  %1751 = vpow2.f32 %v1630_v11  ;;  %v1531_v7 = vld [vmem:[#allocation4 + $0x20] sm:$0xff] }
 0x4e1   :  { %v1339_v20 = vadd.f32 1.0, %v1750_v14  ;;  %v1530_v14 = vld [vmem:[#allocation4 + $0x18] sm:$0xff] }
 0x4e2   :  { %1753 = vrcp.f32 %v1320_v18  ;;  %v1332_v50 = vand.u32 2147483648, %v1320_v18  ;;  %v1330_v38 = vand.u32 2147483647, %v1320_v18  ;;  %vm1326_vm12 = vweird.f32 %v1320_v18 }
 0x4e3   :  { %1755 = vrcp.f32 %v1339_v20  ;;  %v1351_v46 = vand.u32 2147483648, %v1339_v20  ;;  %v1349_v33 = vand.u32 2147483647, %v1339_v20  ;;  %vm1345_vm13 = vweird.f32 %v1339_v20 }
 0x4e4   :  { %v1333_v49 = vor.u32 1.1754944e-38, %v1332_v50  ;;  %vm1331_vm0 = vcmp.eq.f32.partialorder %v1330_v38, 8.507059e+37 }
 0x4e5   :  { %v1352_v35 = vor.u32 1.1754944e-38, %v1351_v46  ;;  %vm1350_vm1 = vcmp.eq.f32.partialorder %v1349_v33, 8.507059e+37 }
 0x4e6   :  { %v1752_v23 = vpop.eup %1751 }
 0x4e7   :  { %v1359_v24 = vadd.f32 1.0, %v1752_v23  ;;  %v3274_v23 = vld [vmem:[#allocation60_spill] sm:$0xff] }
 0x4e8   :  { %v1754_v43 = vpop.eup %1753 }
 0x4e9   :  { %v1756_v26 = vpop.eup %1755  ;;  %v1322_v27 = vmul.f32 %v1754_v43, %v1320_v18  ;;  %1757 = vrcp.f32 %v1359_v24  ;;  %vm1327_vm10 = vweird.f32 %v1754_v43  ;;  %v1371_v62 = vand.u32 2147483648, %v1359_v24  ;;  %v1529_v18 = vld [vmem:[#allocation4 + $0x10] sm:$0xff] }
 0x4ea   :  { %v1341_v44 = vmul.f32 %v1756_v26, %v1339_v20  ;;  %1759 = vtanh.f32 %v1315_v36  ;;  %vm1346_vm11 = vweird.f32 %v1756_v26  ;;  %vm1328_vm14 = vmor %vm1326_vm12, %vm1327_vm10  ;;  %vm1365_vm3 = vweird.f32 %v1359_v24 }
 0x4eb   :  { %v1323_v21 = vsub.f32 1.0, %v1322_v27  ;;  %vm1347_vm15 = vmor %vm1345_vm13, %vm1346_vm11  ;;  %v1369_v0 = vand.u32 2147483647, %v1359_v24  ;;  %v1372_v32 = vor.u32 1.1754944e-38, %v1371_v62 }
 0x4ec   :  { %v1342_v31 = vsub.f32 1.0, %v1341_v44 }
 0x4ed   :  { %v1324_v29 = vmul.f32 %v1754_v43, %v1323_v21  ;;  %vm1370_vm5 = vcmp.eq.f32.partialorder %v1369_v0, 8.507059e+37 }
 0x4ee   :  { %v1343_v51 = vmul.f32 %v1756_v26, %v1342_v31 }
 0x4ef   :  { %v1758_v34 = vpop.eup %1757  ;;  %v1325_v40 = vadd.f32 %v1754_v43, %v1324_v29  ;;  %v3275_v29 = vld [vmem:[#allocation59_spill] sm:$0xff] }
 0x4f0   :  { %v1344_v39 = vadd.f32 %v1756_v26, %v1343_v51  ;;  %v1361_v25 = vmul.f32 %v1758_v34, %v1359_v24  ;;  %v1760_v30 = vpop.eup %1759  ;;  %vm1366_vm2 = vweird.f32 %v1758_v34 }
 0x4f1   :  { %v1329_v37 = vsel %vm1328_vm14, %v1754_v43, %v1325_v40  ;;  %vm1367_vm4 = vmor %vm1365_vm3, %vm1366_vm2  ;;  %v1527_v43 = vld [vmem:[#allocation4] sm:$0xff] }
 0x4f2   :  { %v1334_v42 = vsel %vm1331_vm0, %v1333_v49, %v1329_v37  ;;  %v1348_v28 = vsel %vm1347_vm15, %v1756_v26, %v1344_v39  ;;  %v1362_v47 = vsub.f32 1.0, %v1361_v25 }
 0x4f3   :  { %v1353_v54 = vsel %vm1350_vm1, %v1352_v35, %v1348_v28  ;;  %v1376_v52 = vmul.f32 %v1760_v30, %v1334_v42 }
 0x4f4   :  { %v1375_v53 = vmul.f32 %v1353_v54, %v2947_v13  ;;  %v1363_v55 = vmul.f32 %v1758_v34, %v1362_v47  ;;  %v1542_v13 = vld [vmem:[#allocation4 + $0x78] sm:$0xff] }
 0x4f5   :  { %1547 = vmatpush.msrb.mxu0 %v1542_v13 }
 0x4f6   :  { %v2955_v56 = vadd.f32 %v1376_v52, %v1375_v53  ;;  %v1364_v57 = vadd.f32 %v1758_v34, %v1363_v55 }
 0x4f7   :  { %1548 = vmatpush.msrb.mxu0 %v1541_v6 }
 0x4f8   :  { %1761 = vtanh.f32 %v2955_v56  ;;  %v1368_v4 = vsel %vm1367_vm4, %v1758_v34, %v1364_v57 }
 0x4f9   :  { %v1373_v17 = vsel %vm1370_vm5, %v1372_v32, %v1368_v4  ;;  %1549 = vmatpush.msrb.mxu0 %v1540_v16 }
 0x4fb   :  { %1550 = vmatpush.msrb.mxu0 %v1539_v45 }
 0x4fd   :  { %1551 = vmatpush.msrb.mxu0 %v1538_v10 }
 0x4fe   :  { %v1762_v2 = vpop.eup %1761 }
 0x4ff   :  { %v1379_v19 = vmul.f32 %v1762_v2, %v1373_v17  ;;  %1552 = vmatpush.msrb.mxu0 %v1537_v63 }
 0x501   :  { %1396 = vmatmul.f32.vlgmr.msra.gmra.mxu0 %v1379_v19  ;;  %1416 = vmatmul.f32.vlgmr.msrb.gmra.mxu1 %v1379_v19 }
 0x502   :  { %1436 = vmatmul.f32.vlgmr.msrb.gmra.mxu2 %v1379_v19  ;;  %1456 = vmatmul.f32.vlgmr.msrb.gmra.mxu3 %v1379_v19 }
 0x503   :  { %1553 = vmatpush.msrb.mxu0 %v1536_v1 }
 0x505   :  { %1554 = vmatpush.msrb.mxu0 %v1535_v41 }
 0x507   :  { %1555 = vmatpush.msrb.mxu0 %v1534_v60 }
 0x509   :  { %1556 = vmatpush.msrb.mxu0 %v1533_v8 }
 0x50b   :  { %1557 = vmatpush.msrb.mxu0 %v1532_v15 }
 0x50d   :  { %1558 = vmatpush.msrb.mxu0 %v1531_v7 }
 0x50f   :  { %1559 = vmatpush.msrb.mxu0 %v1530_v14 }
 0x511   :  { %1560 = vmatpush.msrb.mxu0 %v1529_v18 }
 0x513   :  { %1561 = vmatpush.msrb.mxu0 %v1528_v22 }
 0x515   :  { %1562 = vmatpush.msrb.mxu0 %v1527_v43 }
 0x57e   :  { %v1397_v3 = vpop.f32.mrf.mxu0  ;;  %v1417_v5 = vpop.f32.mrf.mxu1 }
 0x57f   :  { %v1460_v59 = vadd.f32 %v1397_v3, %v3272_v9  ;;  %v1461_v61 = vadd.f32 %v1417_v5, %v3273_v12 }
 0x581   :  { %v1631_v58 = vmul.f32 -1.442695, %v1460_v59  ;;  %v1632_v11 = vmul.f32 -1.442695, %v1461_v61 }
 0x583   :  { %1763 = vpow2.f32 %v1631_v58 }
 0x584   :  { %1765 = vpow2.f32 %v1632_v11 }
 0x585   :  { %v1457_v20 = vpop.f32.mrf.mxu3  ;;  %v1437_v21 = vpop.f32.mrf.mxu2 }
 0x586   :  { %v1463_v24 = vadd.f32 %v1457_v20, %v3274_v23  ;;  %v1462_v38 = vadd.f32 %v1437_v21, %v3275_v29 }
 0x588   :  { %v1633_v48 = vmul.f32 -1.442695, %v1463_v24 }
 0x589   :  { %v1764_v36 = vpop.eup %1763 }
 0x58a   :  { %v1766_v26 = vpop.eup %1765  ;;  %v1467_v27 = vadd.f32 1.0, %v1764_v36  ;;  %1767 = vpow2.f32 %v1633_v48 }
 0x58b   :  { %v1486_v44 = vadd.f32 1.0, %v1766_v26 }
 0x58c   :  { %1769 = vrcp.f32 %v1467_v27  ;;  %v1479_v39 = vand.u32 2147483648, %v1467_v27  ;;  %v1477_v37 = vand.u32 2147483647, %v1467_v27  ;;  %vm1473_vm8 = vweird.f32 %v1467_v27 }
 0x58d   :  { %1771 = vrcp.f32 %v1486_v44  ;;  %v1498_v25 = vand.u32 2147483648, %v1486_v44  ;;  %v1496_v42 = vand.u32 2147483647, %v1486_v44  ;;  %vm1492_vm9 = vweird.f32 %v1486_v44 }
 0x58e   :  { %v1480_v54 = vor.u32 1.1754944e-38, %v1479_v39  ;;  %vm1478_vm12 = vcmp.eq.f32.partialorder %v1477_v37, 8.507059e+37 }
 0x58f   :  { %v1499_v55 = vor.u32 1.1754944e-38, %v1498_v25  ;;  %vm1497_vm13 = vcmp.eq.f32.partialorder %v1496_v42, 8.507059e+37 }
 0x590   :  { %v1768_v31 = vpop.eup %1767 }
 0x591   :  { %v1506_v50 = vadd.f32 1.0, %v1768_v31 }
 0x592   :  { %v1770_v46 = vpop.eup %1769 }
 0x593   :  { %v1772_v51 = vpop.eup %1771  ;;  %v1469_v33 = vmul.f32 %v1770_v46, %v1467_v27  ;;  %1773 = vrcp.f32 %v1506_v50  ;;  %vm1474_vm6 = vweird.f32 %v1770_v46  ;;  %v1518_v45 = vand.u32 2147483648, %v1506_v50 }
 0x594   :  { %v1488_v34 = vmul.f32 %v1772_v51, %v1486_v44  ;;  %1775 = vtanh.f32 %v1462_v38  ;;  %vm1493_vm7 = vweird.f32 %v1772_v51  ;;  %vm1475_vm10 = vmor %vm1473_vm8, %vm1474_vm6  ;;  %vm1512_vm15 = vweird.f32 %v1506_v50 }
 0x595   :  { %v1470_v40 = vsub.f32 1.0, %v1469_v33  ;;  %vm1494_vm11 = vmor %vm1492_vm9, %vm1493_vm7  ;;  %v1516_v10 = vand.u32 2147483647, %v1506_v50  ;;  %v1519_v1 = vor.u32 1.1754944e-38, %v1518_v45 }
 0x596   :  { %v1489_v49 = vsub.f32 1.0, %v1488_v34 }
 0x597   :  { %v1471_v35 = vmul.f32 %v1770_v46, %v1470_v40  ;;  %vm1517_vm1 = vcmp.eq.f32.partialorder %v1516_v10, 8.507059e+37 }
 0x598   :  { %v1490_v30 = vmul.f32 %v1772_v51, %v1489_v49 }
 0x599   :  { %v1774_v28 = vpop.eup %1773  ;;  %v1472_v47 = vadd.f32 %v1770_v46, %v1471_v35 }
 0x59a   :  { %v1491_v52 = vadd.f32 %v1772_v51, %v1490_v30  ;;  %v1508_v53 = vmul.f32 %v1774_v28, %v1506_v50  ;;  %v1776_v62 = vpop.eup %1775  ;;  %vm1513_vm14 = vweird.f32 %v1774_v28 }
 0x59b   :  { %v1476_v57 = vsel %vm1475_vm10, %v1770_v46, %v1472_v47  ;;  %vm1514_vm0 = vmor %vm1512_vm15, %vm1513_vm14 }
 0x59c   :  { %v1481_v0 = vsel %vm1478_vm12, %v1480_v54, %v1476_v57  ;;  %v1495_v4 = vsel %vm1494_vm11, %v1772_v51, %v1491_v52  ;;  %v1509_v32 = vsub.f32 1.0, %v1508_v53 }
 0x59d   :  { %v1500_v2 = vsel %vm1497_vm13, %v1499_v55, %v1495_v4  ;;  %v1523_v17 = vmul.f32 %v1776_v62, %v1481_v0 }
 0x59e   :  { %v1522_v19 = vmul.f32 %v1500_v2, %v2955_v56  ;;  %v1510_v13 = vmul.f32 %v1774_v28, %v1509_v32  ;;  %v1650_v56 = vld [vmem:[%s2974_s5] ss:$0 sm:$0xff] }
 0x5a0   :  { %v1524_v6 = vadd.f32 %v1523_v17, %v1522_v19  ;;  %v1511_v16 = vadd.f32 %v1774_v28, %v1510_v13 }
 0x5a2   :  { %1777 = vtanh.f32 %v1524_v6  ;;  %v1515_v63 = vsel %vm1514_vm0, %v1774_v28, %v1511_v16 }
 0x5a3   :  { %v1520_v60 = vsel %vm1517_vm1, %v1519_v1, %v1515_v63 }
 0x5a8   :  { %v1778_v41 = vpop.eup %1777 }
 0x5a9   :  { %v1526_v8 = vmul.f32 %v1778_v41, %v1520_v60 }
 0x5ab   :  { %1563 = vmatmul.f32.vlgmr.msrb.gmra.mxu0 %v1526_v8 }
 0x628   :  { %v1564_v3 = vpop.f32.mrf.mxu0 }
 0x629   :  { %v1565_v5 = vadd.f32 %v1650_v56, %v1564_v3 }
 0x62b   :  { %1567 = vst [vmem:[%s2975_s6] sm:$0xff] %v1565_v5 }
 0x62c   :  { %1572 = vsyncpa [#allocation3], 1 }
 0x62d   :  { %1573 = vsyncpa [#allocation5], 1 }

</bundles_post_ra>
